<compile_context>
chip_gen: v7x
topology: tpu7x:2x2x1
jax: 0.10.0
libtpu: 0.0.40
codegen_flags: <defaults>
</compile_context>

<pallas_src>
import jax
import jax.numpy as jnp
from jax.experimental import pallas as pl
from jax.experimental.pallas import tpu as pltpu

# ---------------- problem sizes (small, consistent with the module) ---------
B, T, D, E = 2, 8, 32, 4          # batch, seq, num_dims, num_experts
H_UP = 8 * D                      # experts_up output features (before chunk-2)
H_GLU = 4 * D                     # post-GLU hidden = experts_down input features
N = B * T                         # flattened tokens


# ---------------- fused kernel: merge + GLU MLP ------------------------------
def smear_fused_kernel(rw_ref, x_ref, wu_ref, bu_ref, wd_ref, bd_ref, o_ref,
                       mwu_ref, mbu_ref, mwd_ref, mbd_ref):
    # rw_ref : (E,)            routing weights, SMEM scalars
    # x_ref  : (N, D)          flattened tokens
    # wu_ref : (E, H_UP, D)    expert up weights, torch (out, in) layout
    # bu_ref : (E, H_UP)
    # wd_ref : (E, D, H_GLU)   expert down weights, torch (out, in) layout
    # bd_ref : (E, D)
    # scratch: merged params held only in VMEM (never touch HBM)

    # ---- SMEAR soft-merge of expert parameters (accumulate into refs) ----
    w0 = rw_ref[0]
    mwu_ref[...] = w0 * wu_ref[0]
    mbu_ref[...] = w0 * bu_ref[pl.ds(0, 1), :]
    mwd_ref[...] = w0 * wd_ref[0]
    mbd_ref[...] = w0 * bd_ref[pl.ds(0, 1), :]
    for e in range(1, E):                       # static unroll; E is tiny
        w = rw_ref[e]
        mwu_ref[...] += w * wu_ref[e]
        mbu_ref[...] += w * bu_ref[pl.ds(e, 1), :]
        mwd_ref[...] += w * wd_ref[e]
        mbd_ref[...] += w * bd_ref[pl.ds(e, 1), :]

    # ---- fused GLU MLP over all tokens in a single block ----
    x = x_ref[...]                                              # (N, D)
    # F.linear: x @ W.T -> contract in-features of both operands on the MXU
    h = jax.lax.dot_general(
        x, mwu_ref[...],
        dimension_numbers=(((1,), (1,)), ((), ())),
        preferred_element_type=jnp.float32) + mbu_ref[...]      # (N, 8D)
    linear = h[:, :H_GLU]                                       # chunk(2, dim=-1)
    gated = h[:, H_GLU:]
    # act = SiLU; dropout = identity (eval mode)
    y = linear * (gated * jax.lax.logistic(gated))              # (N, 4D)
    out = jax.lax.dot_general(
        y, mwd_ref[...],
        dimension_numbers=(((1,), (1,)), ((), ())),
        preferred_element_type=jnp.float32) + mbd_ref[...]      # (N, D)
    o_ref[...] = out.astype(o_ref.dtype)


def smear_fused(route_w, xf, wu_stack, bu_stack, wd_stack, bd_stack):
    return pl.pallas_call(
        smear_fused_kernel,
        out_shape=jax.ShapeDtypeStruct((N, D), xf.dtype),
        in_specs=[
            pl.BlockSpec(memory_space=pltpu.MemorySpace.SMEM),   # route_w
            pl.BlockSpec(memory_space=pltpu.MemorySpace.VMEM),   # x
            pl.BlockSpec(memory_space=pltpu.MemorySpace.VMEM),   # up weights
            pl.BlockSpec(memory_space=pltpu.MemorySpace.VMEM),   # up biases
            pl.BlockSpec(memory_space=pltpu.MemorySpace.VMEM),   # down weights
            pl.BlockSpec(memory_space=pltpu.MemorySpace.VMEM),   # down biases
        ],
        out_specs=pl.BlockSpec(memory_space=pltpu.MemorySpace.VMEM),
        scratch_shapes=[
            pltpu.VMEM((H_UP, D), jnp.float32),    # merged up weights
            pltpu.VMEM((1, H_UP), jnp.float32),    # merged up bias
            pltpu.VMEM((D, H_GLU), jnp.float32),   # merged down weights
            pltpu.VMEM((1, D), jnp.float32),       # merged down bias
        ],
    )(route_w, xf, wu_stack, bu_stack, wd_stack, bd_stack)


# ---------------- full forward ----------------------------------------------
def smear_forward(x, params):
    wr, br = params["router_w"], params["router_b"]
    wu_stack, bu_stack = params["up_w"], params["up_b"]        # (E,8D,D), (E,8D)
    wd_stack, bd_stack = params["down_w"], params["down_b"]    # (E,D,4D), (E,D)

    # --- routing (tiny glue, stays in JAX) ---
    reduced = x.mean(axis=1)                                   # (B, D)
    logits = reduced @ wr.T + br                               # (B, E)
    probs = jax.nn.softmax(logits, axis=-1)
    route_w = probs.mean(axis=0).astype(jnp.float32)           # (E,)

    # --- single fused kernel: merge experts in VMEM + GLU MLP ---
    xf = x.reshape(N, D)
    out = smear_fused(route_w, xf, wu_stack, bu_stack, wd_stack, bd_stack)
    return out.reshape(B, T, D)


# ---------------- pure-JAX reference (matches PyTorch semantics) ------------
def smear_reference(x, params):
    wr, br = params["router_w"], params["router_b"]
    wu_stack, bu_stack = params["up_w"], params["up_b"]
    wd_stack, bd_stack = params["down_w"], params["down_b"]
    reduced = x.mean(axis=1)
    probs = jax.nn.softmax(reduced @ wr.T + br, axis=-1)
    rw = probs.mean(axis=0)                                    # (E,)
    up_w = jnp.einsum("e,eod->od", rw, wu_stack)               # (8D, D)
    up_b = rw @ bu_stack                                       # (8D,)
    dn_w = jnp.einsum("e,eod->od", rw, wd_stack)               # (D, 4D)
    dn_b = rw @ bd_stack                                       # (D,)
    h = x @ up_w.T + up_b
    lin, gat = jnp.split(h, 2, axis=-1)
    y = lin * jax.nn.silu(gat)
    return y @ dn_w.T + dn_b


# ---------------- deterministic parameter init -------------------------------
def init_params(key):
    ks = jax.random.split(key, 7)
    scale = 0.05
    return {
        "router_w": scale * jax.random.normal(ks[0], (E, D), jnp.float32),
        "router_b": scale * jax.random.normal(ks[1], (E,), jnp.float32),
        "up_w":   scale * jax.random.normal(ks[2], (E, H_UP, D), jnp.float32),
        "up_b":   scale * jax.random.normal(ks[3], (E, H_UP), jnp.float32),
        "down_w": scale * jax.random.normal(ks[4], (E, D, H_GLU), jnp.float32),
        "down_b": scale * jax.random.normal(ks[5], (E, D), jnp.float32),
        "x_key": ks[6],
    }


if __name__ == "__main__":
    key = jax.random.PRNGKey(0)
    params = init_params(key)
    x = jax.random.normal(params["x_key"], (B, T, D), jnp.float32)

    out = jax.block_until_ready(smear_forward(x, params))
    ref = jax.block_until_ready(smear_reference(x, params))

    assert out.shape == (B, T, D), out.shape
    assert jnp.allclose(out, ref, rtol=1e-4, atol=1e-5), (
        float(jnp.max(jnp.abs(out - ref))))
    print("KERNEL_OK")
</pallas_src>

<mosaic_0001>
module attributes {stable_mosaic.version = 11 : i64} {
  func.func @smear_fused_kernel(%arg0: memref<4xf32, #tpu.memory_space<smem>>, %arg1: memref<16x32xf32, #tpu.memory_space<vmem>>, %arg2: memref<4x256x32xf32, #tpu.memory_space<vmem>>, %arg3: memref<4x256xf32, #tpu.memory_space<vmem>>, %arg4: memref<4x32x128xf32, #tpu.memory_space<vmem>>, %arg5: memref<4x32xf32, #tpu.memory_space<vmem>>, %arg6: memref<16x32xf32, #tpu.memory_space<vmem>>, %arg7: memref<256x32xf32, #tpu.memory_space<vmem>>, %arg8: memref<1x256xf32, #tpu.memory_space<vmem>>, %arg9: memref<32x128xf32, #tpu.memory_space<vmem>>, %arg10: memref<1x32xf32, #tpu.memory_space<vmem>>) attributes {dimension_semantics = [], scalar_prefetch = 0 : i64, scratch_operands = 4 : i64, tpu.core_type = #tpu.core_type<tc>} {
    %c0 = arith.constant 0 : index
    %0 = memref.load %arg0[%c0] : memref<4xf32, #tpu.memory_space<smem>>
    %c0_0 = arith.constant 0 : index
    %c0_1 = arith.constant 0 : index
    %c0_2 = arith.constant 0 : index
    %1 = vector.load %arg2[%c0_0, %c0_1, %c0_2] : memref<4x256x32xf32, #tpu.memory_space<vmem>>, vector<1x256x32xf32>
    %2 = vector.shape_cast %1 : vector<1x256x32xf32> to vector<256x32xf32>
    %3 = vector.broadcast %0 : f32 to vector<256x32xf32>
    %4 = arith.mulf %3, %2 : vector<256x32xf32>
    %c0_3 = arith.constant 0 : index
    %c0_4 = arith.constant 0 : index
    %5 = vector.load %arg7[%c0_3, %c0_4] : memref<256x32xf32, #tpu.memory_space<vmem>>, vector<256x32xf32>
    tpu.vector_store %arg7[%c0_3, %c0_4], %4 {strides = array<i32>} : memref<256x32xf32, #tpu.memory_space<vmem>>, vector<256x32xf32>,
    %c0_5 = arith.constant 0 : index
    %c0_6 = arith.constant 0 : index
    %6 = vector.load %arg3[%c0_5, %c0_6] : memref<4x256xf32, #tpu.memory_space<vmem>>, vector<1x256xf32>
    %7 = vector.broadcast %0 : f32 to vector<1x256xf32>
    %8 = arith.mulf %7, %6 : vector<1x256xf32>
    %c0_7 = arith.constant 0 : index
    %c0_8 = arith.constant 0 : index
    %9 = vector.load %arg8[%c0_7, %c0_8] : memref<1x256xf32, #tpu.memory_space<vmem>>, vector<1x256xf32>
    tpu.vector_store %arg8[%c0_7, %c0_8], %8 {strides = array<i32>} : memref<1x256xf32, #tpu.memory_space<vmem>>, vector<1x256xf32>,
    %c0_9 = arith.constant 0 : index
    %c0_10 = arith.constant 0 : index
    %c0_11 = arith.constant 0 : index
    %10 = vector.load %arg4[%c0_9, %c0_10, %c0_11] : memref<4x32x128xf32, #tpu.memory_space<vmem>>, vector<1x32x128xf32>
    %11 = vector.shape_cast %10 : vector<1x32x128xf32> to vector<32x128xf32>
    %12 = vector.broadcast %0 : f32 to vector<32x128xf32>
    %13 = arith.mulf %12, %11 : vector<32x128xf32>
    %c0_12 = arith.constant 0 : index
    %c0_13 = arith.constant 0 : index
    %14 = vector.load %arg9[%c0_12, %c0_13] : memref<32x128xf32, #tpu.memory_space<vmem>>, vector<32x128xf32>
    tpu.vector_store %arg9[%c0_12, %c0_13], %13 {strides = array<i32>} : memref<32x128xf32, #tpu.memory_space<vmem>>, vector<32x128xf32>,
    %c0_14 = arith.constant 0 : index
    %c0_15 = arith.constant 0 : index
    %15 = vector.load %arg5[%c0_14, %c0_15] : memref<4x32xf32, #tpu.memory_space<vmem>>, vector<1x32xf32>
    %16 = vector.broadcast %0 : f32 to vector<1x32xf32>
    %17 = arith.mulf %16, %15 : vector<1x32xf32>
    %c0_16 = arith.constant 0 : index
    %c0_17 = arith.constant 0 : index
    %18 = vector.load %arg10[%c0_16, %c0_17] : memref<1x32xf32, #tpu.memory_space<vmem>>, vector<1x32xf32>
    tpu.vector_store %arg10[%c0_16, %c0_17], %17 {strides = array<i32>} : memref<1x32xf32, #tpu.memory_space<vmem>>, vector<1x32xf32>,
    %c1 = arith.constant 1 : index
    %19 = memref.load %arg0[%c1] : memref<4xf32, #tpu.memory_space<smem>>
    %c0_18 = arith.constant 0 : index
    %c0_19 = arith.constant 0 : index
    %20 = vector.load %arg7[%c0_18, %c0_19] : memref<256x32xf32, #tpu.memory_space<vmem>>, vector<256x32xf32>
    %c1_20 = arith.constant 1 : index
    %c0_21 = arith.constant 0 : index
    %c0_22 = arith.constant 0 : index
    %21 = vector.load %arg2[%c1_20, %c0_21, %c0_22] : memref<4x256x32xf32, #tpu.memory_space<vmem>>, vector<1x256x32xf32>
    %22 = vector.shape_cast %21 : vector<1x256x32xf32> to vector<256x32xf32>
    %23 = vector.broadcast %19 : f32 to vector<256x32xf32>
    %24 = arith.mulf %23, %22 : vector<256x32xf32>
    %25 = arith.addf %20, %24 : vector<256x32xf32>
    %c0_23 = arith.constant 0 : index
    %c0_24 = arith.constant 0 : index
    %26 = vector.load %arg7[%c0_23, %c0_24] : memref<256x32xf32, #tpu.memory_space<vmem>>, vector<256x32xf32>
    tpu.vector_store %arg7[%c0_23, %c0_24], %25 {strides = array<i32>} : memref<256x32xf32, #tpu.memory_space<vmem>>, vector<256x32xf32>,
    %c0_25 = arith.constant 0 : index
    %c0_26 = arith.constant 0 : index
    %27 = vector.load %arg8[%c0_25, %c0_26] : memref<1x256xf32, #tpu.memory_space<vmem>>, vector<1x256xf32>
    %c1_27 = arith.constant 1 : index
    %c0_28 = arith.constant 0 : index
    %28 = vector.load %arg3[%c1_27, %c0_28] : memref<4x256xf32, #tpu.memory_space<vmem>>, vector<1x256xf32>
    %29 = vector.broadcast %19 : f32 to vector<1x256xf32>
    %30 = arith.mulf %29, %28 : vector<1x256xf32>
    %31 = arith.addf %27, %30 : vector<1x256xf32>
    %c0_29 = arith.constant 0 : index
    %c0_30 = arith.constant 0 : index
    %32 = vector.load %arg8[%c0_29, %c0_30] : memref<1x256xf32, #tpu.memory_space<vmem>>, vector<1x256xf32>
    tpu.vector_store %arg8[%c0_29, %c0_30], %31 {strides = array<i32>} : memref<1x256xf32, #tpu.memory_space<vmem>>, vector<1x256xf32>,
    %c0_31 = arith.constant 0 : index
    %c0_32 = arith.constant 0 : index
    %33 = vector.load %arg9[%c0_31, %c0_32] : memref<32x128xf32, #tpu.memory_space<vmem>>, vector<32x128xf32>
    %c1_33 = arith.constant 1 : index
    %c0_34 = arith.constant 0 : index
    %c0_35 = arith.constant 0 : index
    %34 = vector.load %arg4[%c1_33, %c0_34, %c0_35] : memref<4x32x128xf32, #tpu.memory_space<vmem>>, vector<1x32x128xf32>
    %35 = vector.shape_cast %34 : vector<1x32x128xf32> to vector<32x128xf32>
    %36 = vector.broadcast %19 : f32 to vector<32x128xf32>
    %37 = arith.mulf %36, %35 : vector<32x128xf32>
    %38 = arith.addf %33, %37 : vector<32x128xf32>
    %c0_36 = arith.constant 0 : index
    %c0_37 = arith.constant 0 : index
    %39 = vector.load %arg9[%c0_36, %c0_37] : memref<32x128xf32, #tpu.memory_space<vmem>>, vector<32x128xf32>
    tpu.vector_store %arg9[%c0_36, %c0_37], %38 {strides = array<i32>} : memref<32x128xf32, #tpu.memory_space<vmem>>, vector<32x128xf32>,
    %c0_38 = arith.constant 0 : index
    %c0_39 = arith.constant 0 : index
    %40 = vector.load %arg10[%c0_38, %c0_39] : memref<1x32xf32, #tpu.memory_space<vmem>>, vector<1x32xf32>
    %c1_40 = arith.constant 1 : index
    %c0_41 = arith.constant 0 : index
    %41 = vector.load %arg5[%c1_40, %c0_41] : memref<4x32xf32, #tpu.memory_space<vmem>>, vector<1x32xf32>
    %42 = vector.broadcast %19 : f32 to vector<1x32xf32>
    %43 = arith.mulf %42, %41 : vector<1x32xf32>
    %44 = arith.addf %40, %43 : vector<1x32xf32>
    %c0_42 = arith.constant 0 : index
    %c0_43 = arith.constant 0 : index
    %45 = vector.load %arg10[%c0_42, %c0_43] : memref<1x32xf32, #tpu.memory_space<vmem>>, vector<1x32xf32>
    tpu.vector_store %arg10[%c0_42, %c0_43], %44 {strides = array<i32>} : memref<1x32xf32, #tpu.memory_space<vmem>>, vector<1x32xf32>,
    %c2 = arith.constant 2 : index
    %46 = memref.load %arg0[%c2] : memref<4xf32, #tpu.memory_space<smem>>
    %c0_44 = arith.constant 0 : index
    %c0_45 = arith.constant 0 : index
    %47 = vector.load %arg7[%c0_44, %c0_45] : memref<256x32xf32, #tpu.memory_space<vmem>>, vector<256x32xf32>
    %c2_46 = arith.constant 2 : index
    %c0_47 = arith.constant 0 : index
    %c0_48 = arith.constant 0 : index
    %48 = vector.load %arg2[%c2_46, %c0_47, %c0_48] : memref<4x256x32xf32, #tpu.memory_space<vmem>>, vector<1x256x32xf32>
    %49 = vector.shape_cast %48 : vector<1x256x32xf32> to vector<256x32xf32>
    %50 = vector.broadcast %46 : f32 to vector<256x32xf32>
    %51 = arith.mulf %50, %49 : vector<256x32xf32>
    %52 = arith.addf %47, %51 : vector<256x32xf32>
    %c0_49 = arith.constant 0 : index
    %c0_50 = arith.constant 0 : index
    %53 = vector.load %arg7[%c0_49, %c0_50] : memref<256x32xf32, #tpu.memory_space<vmem>>, vector<256x32xf32>
    tpu.vector_store %arg7[%c0_49, %c0_50], %52 {strides = array<i32>} : memref<256x32xf32, #tpu.memory_space<vmem>>, vector<256x32xf32>,
    %c0_51 = arith.constant 0 : index
    %c0_52 = arith.constant 0 : index
    %54 = vector.load %arg8[%c0_51, %c0_52] : memref<1x256xf32, #tpu.memory_space<vmem>>, vector<1x256xf32>
    %c2_53 = arith.constant 2 : index
    %c0_54 = arith.constant 0 : index
    %55 = vector.load %arg3[%c2_53, %c0_54] : memref<4x256xf32, #tpu.memory_space<vmem>>, vector<1x256xf32>
    %56 = vector.broadcast %46 : f32 to vector<1x256xf32>
    %57 = arith.mulf %56, %55 : vector<1x256xf32>
    %58 = arith.addf %54, %57 : vector<1x256xf32>
    %c0_55 = arith.constant 0 : index
    %c0_56 = arith.constant 0 : index
    %59 = vector.load %arg8[%c0_55, %c0_56] : memref<1x256xf32, #tpu.memory_space<vmem>>, vector<1x256xf32>
    tpu.vector_store %arg8[%c0_55, %c0_56], %58 {strides = array<i32>} : memref<1x256xf32, #tpu.memory_space<vmem>>, vector<1x256xf32>,
    %c0_57 = arith.constant 0 : index
    %c0_58 = arith.constant 0 : index
    %60 = vector.load %arg9[%c0_57, %c0_58] : memref<32x128xf32, #tpu.memory_space<vmem>>, vector<32x128xf32>
    %c2_59 = arith.constant 2 : index
    %c0_60 = arith.constant 0 : index
    %c0_61 = arith.constant 0 : index
    %61 = vector.load %arg4[%c2_59, %c0_60, %c0_61] : memref<4x32x128xf32, #tpu.memory_space<vmem>>, vector<1x32x128xf32>
    %62 = vector.shape_cast %61 : vector<1x32x128xf32> to vector<32x128xf32>
    %63 = vector.broadcast %46 : f32 to vector<32x128xf32>
    %64 = arith.mulf %63, %62 : vector<32x128xf32>
    %65 = arith.addf %60, %64 : vector<32x128xf32>
    %c0_62 = arith.constant 0 : index
    %c0_63 = arith.constant 0 : index
    %66 = vector.load %arg9[%c0_62, %c0_63] : memref<32x128xf32, #tpu.memory_space<vmem>>, vector<32x128xf32>
    tpu.vector_store %arg9[%c0_62, %c0_63], %65 {strides = array<i32>} : memref<32x128xf32, #tpu.memory_space<vmem>>, vector<32x128xf32>,
    %c0_64 = arith.constant 0 : index
    %c0_65 = arith.constant 0 : index
    %67 = vector.load %arg10[%c0_64, %c0_65] : memref<1x32xf32, #tpu.memory_space<vmem>>, vector<1x32xf32>
    %c2_66 = arith.constant 2 : index
    %c0_67 = arith.constant 0 : index
    %68 = vector.load %arg5[%c2_66, %c0_67] : memref<4x32xf32, #tpu.memory_space<vmem>>, vector<1x32xf32>
    %69 = vector.broadcast %46 : f32 to vector<1x32xf32>
    %70 = arith.mulf %69, %68 : vector<1x32xf32>
    %71 = arith.addf %67, %70 : vector<1x32xf32>
    %c0_68 = arith.constant 0 : index
    %c0_69 = arith.constant 0 : index
    %72 = vector.load %arg10[%c0_68, %c0_69] : memref<1x32xf32, #tpu.memory_space<vmem>>, vector<1x32xf32>
    tpu.vector_store %arg10[%c0_68, %c0_69], %71 {strides = array<i32>} : memref<1x32xf32, #tpu.memory_space<vmem>>, vector<1x32xf32>,
    %c3 = arith.constant 3 : index
    %73 = memref.load %arg0[%c3] : memref<4xf32, #tpu.memory_space<smem>>
    %c0_70 = arith.constant 0 : index
    %c0_71 = arith.constant 0 : index
    %74 = vector.load %arg7[%c0_70, %c0_71] : memref<256x32xf32, #tpu.memory_space<vmem>>, vector<256x32xf32>
    %c3_72 = arith.constant 3 : index
    %c0_73 = arith.constant 0 : index
    %c0_74 = arith.constant 0 : index
    %75 = vector.load %arg2[%c3_72, %c0_73, %c0_74] : memref<4x256x32xf32, #tpu.memory_space<vmem>>, vector<1x256x32xf32>
    %76 = vector.shape_cast %75 : vector<1x256x32xf32> to vector<256x32xf32>
    %77 = vector.broadcast %73 : f32 to vector<256x32xf32>
    %78 = arith.mulf %77, %76 : vector<256x32xf32>
    %79 = arith.addf %74, %78 : vector<256x32xf32>
    %c0_75 = arith.constant 0 : index
    %c0_76 = arith.constant 0 : index
    %80 = vector.load %arg7[%c0_75, %c0_76] : memref<256x32xf32, #tpu.memory_space<vmem>>, vector<256x32xf32>
    tpu.vector_store %arg7[%c0_75, %c0_76], %79 {strides = array<i32>} : memref<256x32xf32, #tpu.memory_space<vmem>>, vector<256x32xf32>,
    %c0_77 = arith.constant 0 : index
    %c0_78 = arith.constant 0 : index
    %81 = vector.load %arg8[%c0_77, %c0_78] : memref<1x256xf32, #tpu.memory_space<vmem>>, vector<1x256xf32>
    %c3_79 = arith.constant 3 : index
    %c0_80 = arith.constant 0 : index
    %82 = vector.load %arg3[%c3_79, %c0_80] : memref<4x256xf32, #tpu.memory_space<vmem>>, vector<1x256xf32>
    %83 = vector.broadcast %73 : f32 to vector<1x256xf32>
    %84 = arith.mulf %83, %82 : vector<1x256xf32>
    %85 = arith.addf %81, %84 : vector<1x256xf32>
    %c0_81 = arith.constant 0 : index
    %c0_82 = arith.constant 0 : index
    %86 = vector.load %arg8[%c0_81, %c0_82] : memref<1x256xf32, #tpu.memory_space<vmem>>, vector<1x256xf32>
    tpu.vector_store %arg8[%c0_81, %c0_82], %85 {strides = array<i32>} : memref<1x256xf32, #tpu.memory_space<vmem>>, vector<1x256xf32>,
    %c0_83 = arith.constant 0 : index
    %c0_84 = arith.constant 0 : index
    %87 = vector.load %arg9[%c0_83, %c0_84] : memref<32x128xf32, #tpu.memory_space<vmem>>, vector<32x128xf32>
    %c3_85 = arith.constant 3 : index
    %c0_86 = arith.constant 0 : index
    %c0_87 = arith.constant 0 : index
    %88 = vector.load %arg4[%c3_85, %c0_86, %c0_87] : memref<4x32x128xf32, #tpu.memory_space<vmem>>, vector<1x32x128xf32>
    %89 = vector.shape_cast %88 : vector<1x32x128xf32> to vector<32x128xf32>
    %90 = vector.broadcast %73 : f32 to vector<32x128xf32>
    %91 = arith.mulf %90, %89 : vector<32x128xf32>
    %92 = arith.addf %87, %91 : vector<32x128xf32>
    %c0_88 = arith.constant 0 : index
    %c0_89 = arith.constant 0 : index
    %93 = vector.load %arg9[%c0_88, %c0_89] : memref<32x128xf32, #tpu.memory_space<vmem>>, vector<32x128xf32>
    tpu.vector_store %arg9[%c0_88, %c0_89], %92 {strides = array<i32>} : memref<32x128xf32, #tpu.memory_space<vmem>>, vector<32x128xf32>,
    %c0_90 = arith.constant 0 : index
    %c0_91 = arith.constant 0 : index
    %94 = vector.load %arg10[%c0_90, %c0_91] : memref<1x32xf32, #tpu.memory_space<vmem>>, vector<1x32xf32>
    %c3_92 = arith.constant 3 : index
    %c0_93 = arith.constant 0 : index
    %95 = vector.load %arg5[%c3_92, %c0_93] : memref<4x32xf32, #tpu.memory_space<vmem>>, vector<1x32xf32>
    %96 = vector.broadcast %73 : f32 to vector<1x32xf32>
    %97 = arith.mulf %96, %95 : vector<1x32xf32>
    %98 = arith.addf %94, %97 : vector<1x32xf32>
    %c0_94 = arith.constant 0 : index
    %c0_95 = arith.constant 0 : index
    %99 = vector.load %arg10[%c0_94, %c0_95] : memref<1x32xf32, #tpu.memory_space<vmem>>, vector<1x32xf32>
    tpu.vector_store %arg10[%c0_94, %c0_95], %98 {strides = array<i32>} : memref<1x32xf32, #tpu.memory_space<vmem>>, vector<1x32xf32>,
    %c0_96 = arith.constant 0 : index
    %c0_97 = arith.constant 0 : index
    %100 = vector.load %arg1[%c0_96, %c0_97] : memref<16x32xf32, #tpu.memory_space<vmem>>, vector<16x32xf32>
    %c0_98 = arith.constant 0 : index
    %c0_99 = arith.constant 0 : index
    %101 = vector.load %arg7[%c0_98, %c0_99] : memref<256x32xf32, #tpu.memory_space<vmem>>, vector<256x32xf32>
    %cst = arith.constant dense<0.000000e+00> : vector<16x256xf32>
    %102 = tpu.matmul %100, %101, %cst {dimension_numbers = #tpu.dot_dimension_numbers<[1], [1], [0], [0], [0, 0, 1, 0], [], []>} : vector<16x32xf32>, vector<256x32xf32>, vector<16x256xf32> -> vector<16x256xf32>
    %c0_100 = arith.constant 0 : index
    %c0_101 = arith.constant 0 : index
    %103 = vector.load %arg8[%c0_100, %c0_101] : memref<1x256xf32, #tpu.memory_space<vmem>>, vector<1x256xf32>
    %104 = vector.broadcast %103 : vector<1x256xf32> to vector<16x256xf32>
    %105 = arith.addf %102, %104 : vector<16x256xf32>
    %106 = vector.extract_strided_slice %105 {offsets = [0, 0], sizes = [16, 128], strides = [1, 1]} : vector<16x256xf32> to vector<16x128xf32>
    %107 = vector.extract_strided_slice %105 {offsets = [0, 128], sizes = [16, 128], strides = [1, 1]} : vector<16x256xf32> to vector<16x128xf32>
    %108 = arith.negf %107 : vector<16x128xf32>
    %109 = math.exp %108 : vector<16x128xf32>
    %cst_102 = arith.constant 1.000000e+00 : f32
    %110 = vector.broadcast %cst_102 : f32 to vector<16x128xf32>
    %111 = arith.addf %110, %109 : vector<16x128xf32>
    %112 = arith.divf %110, %111 : vector<16x128xf32>
    %113 = arith.mulf %107, %112 : vector<16x128xf32>
    %114 = arith.mulf %106, %113 : vector<16x128xf32>
    %c0_103 = arith.constant 0 : index
    %c0_104 = arith.constant 0 : index
    %115 = vector.load %arg9[%c0_103, %c0_104] : memref<32x128xf32, #tpu.memory_space<vmem>>, vector<32x128xf32>
    %cst_105 = arith.constant dense<0.000000e+00> : vector<16x32xf32>
    %116 = tpu.matmul %114, %115, %cst_105 {dimension_numbers = #tpu.dot_dimension_numbers<[1], [1], [0], [0], [0, 0, 1, 0], [], []>} : vector<16x128xf32>, vector<32x128xf32>, vector<16x32xf32> -> vector<16x32xf32>
    %c0_106 = arith.constant 0 : index
    %c0_107 = arith.constant 0 : index
    %117 = vector.load %arg10[%c0_106, %c0_107] : memref<1x32xf32, #tpu.memory_space<vmem>>, vector<1x32xf32>
    %118 = vector.broadcast %117 : vector<1x32xf32> to vector<16x32xf32>
    %119 = arith.addf %116, %118 : vector<16x32xf32>
    %c0_108 = arith.constant 0 : index
    %c0_109 = arith.constant 0 : index
    %120 = vector.load %arg6[%c0_108, %c0_109] : memref<16x32xf32, #tpu.memory_space<vmem>>, vector<16x32xf32>
    tpu.vector_store %arg6[%c0_108, %c0_109], %119 {strides = array<i32>} : memref<16x32xf32, #tpu.memory_space<vmem>>, vector<16x32xf32>,
    return
  }
}

</mosaic_0001>

<bundles_post_ra>
// kernel: tpu_custom_call.1
= control target key start
LH: loop header
LB: loop body
LE: loop exit
PB: predicated region body
PF: predicated region fallthrough
CT: control target
= control target key end

     0   :  { %11 = vsyncpa [#allocation8], 0  ;;  %s2291_s0 = inlined_call_operand.vmem [shape: f32[4], index: 0, kind: input, shape index: {}]   ;;  %s2292_s1 = inlined_call_operand.vmem [shape: f32[16,32], index: 1, kind: input, shape index: {}]   ;;  %s2293_s2 = inlined_call_operand.vmem [shape: f32[4,256,32], index: 2, kind: input, shape index: {}]   ;;  %s2294_s3 = inlined_call_operand.vmem [shape: f32[4,256], index: 3, kind: input, shape index: {}]   ;;  %s2295_s4 = inlined_call_operand.vmem [shape: f32[4,32,128], index: 4, kind: input, shape index: {}]   ;;  %s2296_s5 = inlined_call_operand.vmem [shape: f32[4,32], index: 5, kind: input, shape index: {}]   ;;  %s2297_s6 = inlined_call_operand.hbm [shape: f32[16,32], index: 6, kind: output, shape index: {}]  }
   0x1   :  { %12 = vsyncpa [#allocation7], 0  ;;  %s19_s23 = sshll.u32 %s2291_s0, 4  ;;  %s20_s23 = int_to_ptr.vmem [resolvable:$true] %s19_s23 }
   0x2   :  { %s1362_s24 = scalar_lea.vmem %s20_s23, 16  ;;  %p1367_p1 = scmp.lt.s32.totalorder %s20_s23, %s20_s23 }
   0x3   :  { %p1363_p0 = scmp.ne.s32.totalorder %s20_s23, %s1362_s24  ;;  %p1368_p2 = scmp.lt.s32.totalorder %s1362_s24, %s1362_s24 }
   0x5   :  { %p1369_p3 = por %p1368_p2, %p1367_p1 }
   0x7   :  { %p1370_p4 = pnand %p1369_p3, %p1363_p0 }
   0x9   :  { %1373 = shalt.err (!%p1370_p4)
}
   0xa   :  { %s1400_s25 = smov [#allocation6]  }
   0xb   :  { %22 = dma.vmem_to_smem %s20_s23, 16, %s1400_s25, [#allocation8]  }
   0xc   :  { %1396 = dma.done.wait [#allocation8], 16  }
   0xd   :  { %1397 = vsyncadd [#allocation8], 4294967280 }
   0xe   :  { %36 = sfence }
   0xf   :  { %s37_s26 = sld [smem:[#allocation6]]  ;;  %s1090_s27 = sld [smem:[#allocation6 + $0x1]]  ;;  %v54_v0 = vld [vmem:[%s2293_s2 + $0x80] sm:$0xff]  ;;  %v55_v1 = vld [vmem:[%s2293_s2 + $0x88] sm:$0xff]  ;;  %vm103_vm0 = vcmask 261120   ;;  %v56_v7 = vld [vmem:[%s2293_s2 + $0x90] sm:$0xff] }
  0x10   :  { %v38_v3 = vld [vmem:[%s2293_s2] sm:$0xff]  ;;  %v39_v4 = vld [vmem:[%s2293_s2 + $0x8] sm:$0xff]  ;;  %v57_v10 = vld [vmem:[%s2293_s2 + $0x98] sm:$0xff]  ;;  %s1479_s21 = sld [smem:[#allocation6 + $0x2]]  ;;  %s1504_s7 = sld [smem:[#allocation6 + $0x3]]  ;;  %vm157_vm3 = vcmask 253952  }
  0x11   :  { %v1107_v11 = vld [vmem:[%s2293_s2 + $0x180] sm:$0xff]  ;;  %v1108_v12 = vld [vmem:[%s2293_s2 + $0x188] sm:$0xff]  ;;  %v40_v14 = vld [vmem:[%s2293_s2 + $0x10] sm:$0xff] }
  0x12   :  { %v41_v16 = vld [vmem:[%s2293_s2 + $0x18] sm:$0xff]  ;;  %v1091_v17 = vld [vmem:[%s2293_s2 + $0x100] sm:$0xff]  ;;  %v1092_v18 = vld [vmem:[%s2293_s2 + $0x108] sm:$0xff] }
  0x13   :  { %v58_v20 = vld [vmem:[%s2293_s2 + $0xa0] sm:$0xff]  ;;  %v59_v24 = vld [vmem:[%s2293_s2 + $0xa8] sm:$0xff]  ;;  %v1109_v25 = vld [vmem:[%s2293_s2 + $0x190] sm:$0xff] }
  0x14   :  { %v1110_v29 = vld [vmem:[%s2293_s2 + $0x198] sm:$0xff]  ;;  %v42_v31 = vld [vmem:[%s2293_s2 + $0x20] sm:$0xff]  ;;  %v43_v32 = vld [vmem:[%s2293_s2 + $0x28] sm:$0xff] }
  0x15   :  { %v1448_v2 = vstv %s37_s26  ;;  %v1474_v13 = vstv %s1090_s27  ;;  %v1093_v35 = vld [vmem:[%s2293_s2 + $0x110] sm:$0xff]  ;;  %v1094_v40 = vld [vmem:[%s2293_s2 + $0x118] sm:$0xff]  ;;  %vm1776_vm1 = vmpackc.low %vm103_vm0, %vm103_vm0 }
  0x16   :  { %v87_v5 = vmul.f32 %v1448_v2, %v54_v0  ;;  %v88_v6 = vmul.f32 %v1448_v2, %v55_v1  ;;  %v71_v8 = vmul.f32 %v1448_v2, %v38_v3  ;;  %v72_v9 = vmul.f32 %v1448_v2, %v39_v4  ;;  %v1111_v41 = vld [vmem:[%s2293_s2 + $0x1a0] sm:$0xff]  ;;  %v60_v42 = vld [vmem:[%s2293_s2 + $0xb0] sm:$0xff]  ;;  %v61_v48 = vld [vmem:[%s2293_s2 + $0xb8] sm:$0xff] }
  0x17   :  { %v89_v15 = vmul.f32 %v1448_v2, %v56_v7  ;;  %v90_v19 = vmul.f32 %v1448_v2, %v57_v10  ;;  %v242_v21 = vmul.f32 %v1107_v11, %v1474_v13  ;;  %v243_v22 = vmul.f32 %v1108_v12, %v1474_v13  ;;  %v1145_v49 = vld [vmem:[%s2293_s2 + $0x280] sm:$0xff]  ;;  %v1146_v50 = vld [vmem:[%s2293_s2 + $0x288] sm:$0xff]  ;;  %v44_v4 = vld [vmem:[%s2293_s2 + $0x30] sm:$0xff] }
  0x18   :  { %120 = vst.msk [vmem:[#allocation2 + $0x80] sm:$0xff] %vm103_vm0, %v87_v5  ;;  %121 = vst.msk [vmem:[#allocation2 + $0x88] sm:$0xff] %vm103_vm0, %v88_v6  ;;  %v73_v23 = vmul.f32 %v1448_v2, %v40_v14  ;;  %v74_v26 = vmul.f32 %v1448_v2, %v41_v16  ;;  %v226_v27 = vmul.f32 %v1091_v17, %v1474_v13  ;;  %v1556_v51 = vstv %s1479_s21  ;;  %v1112_v55 = vld [vmem:[%s2293_s2 + $0x1a8] sm:$0xff]  ;;  %v1183_v56 = vld [vmem:[%s2293_s2 + $0x380] sm:$0xff] }
  0x19   :  { %104 = vst.msk [vmem:[#allocation2] sm:$0xff] %vm103_vm0, %v71_v8  ;;  %105 = vst.msk [vmem:[#allocation2 + $0x8] sm:$0xff] %vm103_vm0, %v72_v9  ;;  %v227_v28 = vmul.f32 %v1092_v18, %v1474_v13  ;;  %v91_v30 = vmul.f32 %v1448_v2, %v58_v20  ;;  %v92_v36 = vmul.f32 %v1448_v2, %v59_v24  ;;  %v1129_v57 = vld [vmem:[%s2293_s2 + $0x200] sm:$0xff]  ;;  %v1096_v61 = vld [vmem:[%s2293_s2 + $0x128] sm:$0xff]  ;;  %v1590_v7 = vstv %s1504_s7 }
  0x1a   :  { %122 = vst.msk [vmem:[#allocation2 + $0x90] sm:$0xff] %vm103_vm0, %v89_v15  ;;  %123 = vst.msk [vmem:[#allocation2 + $0x98] sm:$0xff] %vm103_vm0, %v90_v19  ;;  %v244_v39 = vmul.f32 %v1109_v25, %v1474_v13  ;;  %v245_v45 = vmul.f32 %v1110_v29, %v1474_v13  ;;  %v75_v46 = vmul.f32 %v1448_v2, %v42_v31  ;;  %v1095_v60 = vld [vmem:[%s2293_s2 + $0x120] sm:$0xff]  ;;  %v45_v5 = vld [vmem:[%s2293_s2 + $0x38] sm:$0xff] }
  0x1b   :  { %106 = vst.msk [vmem:[#allocation2 + $0x10] sm:$0xff] %vm103_vm0, %v73_v23  ;;  %107 = vst.msk [vmem:[#allocation2 + $0x18] sm:$0xff] %vm103_vm0, %v74_v26  ;;  %v76_v47 = vmul.f32 %v1448_v2, %v43_v32  ;;  %v228_v54 = vmul.f32 %v1093_v35, %v1474_v13  ;;  %v229_v59 = vmul.f32 %v1094_v40, %v1474_v13  ;;  %v1130_v8 = vld [vmem:[%s2293_s2 + $0x208] sm:$0xff]  ;;  %v1147_v10 = vld [vmem:[%s2293_s2 + $0x290] sm:$0xff] }
  0x1c   :  { %124 = vst.msk [vmem:[#allocation2 + $0xa0] sm:$0xff] %vm103_vm0, %v91_v30  ;;  %125 = vst.msk [vmem:[#allocation2 + $0xa8] sm:$0xff] %vm103_vm0, %v92_v36  ;;  %v93_v62 = vmul.f32 %v1448_v2, %v60_v42  ;;  %v246_v1 = vmul.f32 %v1111_v41, %v1474_v13  ;;  %v94_v3 = vmul.f32 %v1448_v2, %v61_v48  ;;  %v1148_v15 = vld [vmem:[%s2293_s2 + $0x298] sm:$0xff]  ;;  %v1131_v18 = vld [vmem:[%s2293_s2 + $0x210] sm:$0xff] }
  0x1d   :  { %108 = vst.msk [vmem:[#allocation2 + $0x20] sm:$0xff] %vm103_vm0, %v75_v46  ;;  %109 = vst.msk [vmem:[#allocation2 + $0x28] sm:$0xff] %vm103_vm0, %v76_v47  ;;  %v437_v6 = vmul.f32 %v1145_v49, %v1556_v51  ;;  %v247_v12 = vmul.f32 %v1112_v55, %v1474_v13  ;;  %v438_v14 = vmul.f32 %v1146_v50, %v1556_v51  ;;  %v1113_v19 = vld [vmem:[%s2293_s2 + $0x1b0] sm:$0xff]  ;;  %v1114_v26 = vld [vmem:[%s2293_s2 + $0x1b8] sm:$0xff] }
  0x1e   :  { %126 = vst.msk [vmem:[#allocation2 + $0xb0] sm:$0xff] %vm103_vm0, %v93_v62  ;;  %127 = vst.msk [vmem:[#allocation2 + $0xb8] sm:$0xff] %vm103_vm0, %v94_v3  ;;  %v77_v20 = vmul.f32 %v1448_v2, %v44_v4  ;;  %v230_v24 = vmul.f32 %v1095_v60, %v1474_v13  ;;  %v231_v25 = vmul.f32 %v1096_v61, %v1474_v13  ;;  %v1132_v32 = vld [vmem:[%s2293_s2 + $0x218] sm:$0xff]  ;;  %v1149_v35 = vld [vmem:[%s2293_s2 + $0x2a0] sm:$0xff] }
  0x1f   :  { %v176_v33 = vld [vmem:[#allocation2 + $0x80] sm:$0xff]  ;;  %v177_v34 = vld [vmem:[#allocation2 + $0x88] sm:$0xff]  ;;  %v1627_v29 = vmul.f32 %v1183_v56, %v1590_v7  ;;  %v421_v30 = vmul.f32 %v1129_v57, %v1556_v51  ;;  %v422_v31 = vmul.f32 %v1130_v8, %v1556_v51  ;;  %v248_v41 = vmul.f32 %v1113_v19, %v1474_v13  ;;  %v1098_v42 = vld [vmem:[%s2293_s2 + $0x138] sm:$0xff] }
  0x20   :  { %v274_v37 = vadd.f32 %v242_v21, %v176_v33  ;;  %v275_v38 = vadd.f32 %v243_v22, %v177_v34  ;;  %v160_v43 = vld [vmem:[#allocation2] sm:$0xff]  ;;  %v161_v44 = vld [vmem:[#allocation2 + $0x8] sm:$0xff]  ;;  %v78_v21 = vmul.f32 %v1448_v2, %v45_v5  ;;  %110 = vst.msk [vmem:[#allocation2 + $0x30] sm:$0xff] %vm103_vm0, %v77_v20  ;;  %v439_v47 = vmul.f32 %v1147_v10, %v1556_v51  ;;  %v1186_v10 = vld [vmem:[%s2293_s2 + $0x398] sm:$0xff] }
  0x21   :  { %v258_v52 = vadd.f32 %v226_v27, %v160_v43  ;;  %v259_v53 = vadd.f32 %v227_v28, %v161_v44  ;;  %v178_v58 = vld [vmem:[#allocation2 + $0x90] sm:$0xff]  ;;  %v179_v63 = vld [vmem:[#allocation2 + $0x98] sm:$0xff]  ;;  %v1184_v28 = vld [vmem:[%s2293_s2 + $0x388] sm:$0xff]  ;;  %v440_v56 = vmul.f32 %v1148_v15, %v1556_v51  ;;  %v423_v57 = vmul.f32 %v1131_v18, %v1556_v51 }
  0x22   :  { %306 = vst.msk [vmem:[#allocation2 + $0x80] sm:$0xff] %vm103_vm0, %v274_v37  ;;  %307 = vst.msk [vmem:[#allocation2 + $0x88] sm:$0xff] %vm103_vm0, %v275_v38  ;;  %v276_v0 = vadd.f32 %v244_v39, %v178_v58  ;;  %v277_v9 = vadd.f32 %v245_v45, %v179_v63  ;;  %v162_v11 = vld [vmem:[#allocation2 + $0x10] sm:$0xff]  ;;  %v163_v16 = vld [vmem:[#allocation2 + $0x18] sm:$0xff]  ;;  %v233_v4 = vmul.f32 %v1098_v42, %v1474_v13 }
  0x23   :  { %290 = vst.msk [vmem:[#allocation2] sm:$0xff] %vm103_vm0, %v258_v52  ;;  %291 = vst.msk [vmem:[#allocation2 + $0x8] sm:$0xff] %vm103_vm0, %v259_v53  ;;  %v260_v17 = vadd.f32 %v228_v54, %v162_v11  ;;  %v261_v22 = vadd.f32 %v229_v59, %v163_v16  ;;  %v180_v23 = vld [vmem:[#allocation2 + $0xa0] sm:$0xff]  ;;  %v1097_v27 = vld [vmem:[%s2293_s2 + $0x130] sm:$0xff]  ;;  %v249_v52 = vmul.f32 %v1114_v26, %v1474_v13 }
  0x24   :  { %308 = vst.msk [vmem:[#allocation2 + $0x90] sm:$0xff] %vm103_vm0, %v276_v0  ;;  %309 = vst.msk [vmem:[#allocation2 + $0x98] sm:$0xff] %vm103_vm0, %v277_v9  ;;  %v181_v33 = vld [vmem:[#allocation2 + $0xa8] sm:$0xff]  ;;  %v278_v34 = vadd.f32 %v246_v1, %v180_v23  ;;  %v62_v36 = vld [vmem:[%s2293_s2 + $0xc0] sm:$0xff]  ;;  %v232_v3 = vmul.f32 %v1097_v27, %v1474_v13  ;;  %v424_v11 = vmul.f32 %v1132_v32, %v1556_v51 }
  0x25   :  { %292 = vst.msk [vmem:[#allocation2 + $0x10] sm:$0xff] %vm103_vm0, %v260_v17  ;;  %111 = vst.msk [vmem:[#allocation2 + $0x38] sm:$0xff] %vm103_vm0, %v78_v21  ;;  %v63_v37 = vld [vmem:[%s2293_s2 + $0xc8] sm:$0xff]  ;;  %v279_v40 = vadd.f32 %v247_v12, %v181_v33  ;;  %v95_v43 = vmul.f32 %v1448_v2, %v62_v36  ;;  %v164_v49 = vld [vmem:[#allocation2 + $0x20] sm:$0xff] }
  0x26   :  { %293 = vst.msk [vmem:[#allocation2 + $0x18] sm:$0xff] %vm103_vm0, %v261_v22  ;;  %v96_v44 = vmul.f32 %v1448_v2, %v63_v37  ;;  %310 = vst.msk [vmem:[#allocation2 + $0xa0] sm:$0xff] %vm103_vm0, %v278_v34  ;;  %v1150_v48 = vld [vmem:[%s2293_s2 + $0x2a8] sm:$0xff]  ;;  %v1167_v55 = vld [vmem:[%s2293_s2 + $0x300] sm:$0xff]  ;;  %v262_v58 = vadd.f32 %v230_v24, %v164_v49  ;;  %v1744_v49 = vmul.f32 %v1186_v10, %v1590_v7 }
  0x27   :  { %v165_v50 = vld [vmem:[#allocation2 + $0x28] sm:$0xff]  ;;  %311 = vst.msk [vmem:[#allocation2 + $0xa8] sm:$0xff] %vm103_vm0, %v279_v40  ;;  %128 = vst.msk [vmem:[#allocation2 + $0xc0] sm:$0xff] %vm103_vm0, %v95_v43  ;;  %v1115_v60 = vld [vmem:[%s2293_s2 + $0x1c0] sm:$0xff]  ;;  %v442_v20 = vmul.f32 %v1150_v48, %v1556_v51  ;;  %v616_v34 = vmul.f32 %v1167_v55, %v1590_v7 }
  0x28   :  { %v263_v59 = vadd.f32 %v231_v25, %v165_v50  ;;  %129 = vst.msk [vmem:[#allocation2 + $0xc8] sm:$0xff] %vm103_vm0, %v96_v44  ;;  %v1168_v63 = vld [vmem:[%s2293_s2 + $0x308] sm:$0xff]  ;;  %v1133_v0 = vld [vmem:[%s2293_s2 + $0x220] sm:$0xff]  ;;  %v182_v1 = vld [vmem:[#allocation2 + $0xb0] sm:$0xff]  ;;  %v250_v23 = vmul.f32 %v1115_v60, %v1474_v13 }
  0x29   :  { %v371_v38 = vld [vmem:[#allocation2 + $0x80] sm:$0xff]  ;;  %v372_v39 = vld [vmem:[#allocation2 + $0x88] sm:$0xff]  ;;  %v1185_v9 = vld [vmem:[%s2293_s2 + $0x390] sm:$0xff]  ;;  %294 = vst.msk [vmem:[#allocation2 + $0x20] sm:$0xff] %vm103_vm0, %v262_v58  ;;  %v280_v17 = vadd.f32 %v248_v41, %v182_v1  ;;  %v617_v41 = vmul.f32 %v1168_v63, %v1590_v7  ;;  %v425_v44 = vmul.f32 %v1133_v0, %v1556_v51 }
  0x2a   :  { %v469_v45 = vadd.f32 %v437_v6, %v371_v38  ;;  %v470_v46 = vadd.f32 %v438_v14, %v372_v39  ;;  %v355_v53 = vld [vmem:[#allocation2] sm:$0xff]  ;;  %v356_v54 = vld [vmem:[#allocation2 + $0x8] sm:$0xff]  ;;  %v1684_v6 = vmul.f32 %v1184_v28, %v1590_v7  ;;  %v1169_v12 = vld [vmem:[%s2293_s2 + $0x310] sm:$0xff]  ;;  %v441_v14 = vmul.f32 %v1149_v35, %v1556_v51  ;;  %295 = vst.msk [vmem:[#allocation2 + $0x28] sm:$0xff] %vm103_vm0, %v263_v59 }
  0x2b   :  { %v453_v61 = vadd.f32 %v421_v30, %v355_v53  ;;  %v454_v62 = vadd.f32 %v422_v31, %v356_v54  ;;  %v1116_v5 = vld [vmem:[%s2293_s2 + $0x1c8] sm:$0xff]  ;;  %v373_v8 = vld [vmem:[#allocation2 + $0x90] sm:$0xff]  ;;  %v183_v16 = vld [vmem:[#allocation2 + $0xb8] sm:$0xff]  ;;  %312 = vst.msk [vmem:[#allocation2 + $0xb0] sm:$0xff] %vm103_vm0, %v280_v17  ;;  %v1741_v48 = vmul.f32 %v1185_v9, %v1590_v7 }
  0x2c   :  { %501 = vst.msk [vmem:[#allocation2 + $0x80] sm:$0xff] %vm103_vm0, %v469_v45  ;;  %502 = vst.msk [vmem:[#allocation2 + $0x88] sm:$0xff] %vm103_vm0, %v470_v46  ;;  %v1134_v15 = vld [vmem:[%s2293_s2 + $0x228] sm:$0xff]  ;;  %v374_v18 = vld [vmem:[#allocation2 + $0x98] sm:$0xff]  ;;  %v471_v19 = vadd.f32 %v439_v47, %v373_v8  ;;  %v281_v21 = vadd.f32 %v249_v52, %v183_v16  ;;  %v251_v31 = vmul.f32 %v1116_v5, %v1474_v13 }
  0x2d   :  { %485 = vst.msk [vmem:[#allocation2] sm:$0xff] %vm103_vm0, %v453_v61  ;;  %486 = vst.msk [vmem:[#allocation2 + $0x8] sm:$0xff] %vm103_vm0, %v454_v62  ;;  %v1151_v22 = vld [vmem:[%s2293_s2 + $0x2b0] sm:$0xff]  ;;  %v46_v24 = vld [vmem:[%s2293_s2 + $0x40] sm:$0xff]  ;;  %v472_v26 = vadd.f32 %v440_v56, %v374_v18  ;;  %v426_v45 = vmul.f32 %v1134_v15, %v1556_v51  ;;  %v1751_v52 = vmul.f32 %v1169_v12, %v1590_v7 }
  0x2e   :  { %v47_v25 = vld [vmem:[%s2293_s2 + $0x48] sm:$0xff]  ;;  %v357_v27 = vld [vmem:[#allocation2 + $0x10] sm:$0xff]  ;;  %v167_v30 = vld [vmem:[#allocation2 + $0x38] sm:$0xff]  ;;  %v79_v32 = vmul.f32 %v1448_v2, %v46_v24  ;;  %503 = vst.msk [vmem:[#allocation2 + $0x90] sm:$0xff] %vm103_vm0, %v471_v19  ;;  %v443_v62 = vmul.f32 %v1151_v22, %v1556_v51 }
  0x2f   :  { %v166_v28 = vld [vmem:[#allocation2 + $0x30] sm:$0xff]  ;;  %v80_v33 = vmul.f32 %v1448_v2, %v47_v25  ;;  %v358_v35 = vld [vmem:[#allocation2 + $0x18] sm:$0xff]  ;;  %v455_v36 = vadd.f32 %v423_v57, %v357_v27  ;;  %313 = vst.msk [vmem:[#allocation2 + $0xb8] sm:$0xff] %vm103_vm0, %v281_v21  ;;  %v265_v39 = vadd.f32 %v233_v4, %v167_v30  ;;  %504 = vst.msk [vmem:[#allocation2 + $0x98] sm:$0xff] %vm103_vm0, %v472_v26 }
  0x30   :  { %v1152_v37 = vld [vmem:[%s2293_s2 + $0x2b8] sm:$0xff]  ;;  %v264_v38 = vadd.f32 %v232_v3, %v166_v28  ;;  %v1135_v40 = vld [vmem:[%s2293_s2 + $0x230] sm:$0xff]  ;;  %v456_v42 = vadd.f32 %v424_v11, %v358_v35  ;;  %v375_v43 = vld [vmem:[#allocation2 + $0xa0] sm:$0xff]  ;;  %112 = vst.msk [vmem:[#allocation2 + $0x40] sm:$0xff] %vm103_vm0, %v79_v32 }
  0x31   :  { %113 = vst.msk [vmem:[#allocation2 + $0x48] sm:$0xff] %vm103_vm0, %v80_v33  ;;  %v1099_v46 = vld [vmem:[%s2293_s2 + $0x140] sm:$0xff]  ;;  %v1100_v47 = vld [vmem:[%s2293_s2 + $0x148] sm:$0xff]  ;;  %487 = vst.msk [vmem:[#allocation2 + $0x10] sm:$0xff] %vm103_vm0, %v455_v36  ;;  %v473_v54 = vadd.f32 %v441_v14, %v375_v43  ;;  %v444_v9 = vmul.f32 %v1152_v37, %v1556_v51  ;;  %v427_v10 = vmul.f32 %v1135_v40, %v1556_v51 }
  0x32   :  { %v1170_v50 = vld [vmem:[%s2293_s2 + $0x318] sm:$0xff]  ;;  %v376_v53 = vld [vmem:[#allocation2 + $0xa8] sm:$0xff]  ;;  %v1187_v55 = vld [vmem:[%s2293_s2 + $0x3a0] sm:$0xff]  ;;  %296 = vst.msk [vmem:[#allocation2 + $0x30] sm:$0xff] %vm103_vm0, %v264_v38  ;;  %v234_v16 = vmul.f32 %v1099_v46, %v1474_v13  ;;  %v235_v17 = vmul.f32 %v1100_v47, %v1474_v13 }
  0x33   :  { %297 = vst.msk [vmem:[#allocation2 + $0x38] sm:$0xff] %vm103_vm0, %v265_v39  ;;  %v184_v56 = vld [vmem:[#allocation2 + $0xc0] sm:$0xff]  ;;  %v185_v57 = vld [vmem:[#allocation2 + $0xc8] sm:$0xff]  ;;  %488 = vst.msk [vmem:[#allocation2 + $0x18] sm:$0xff] %vm103_vm0, %v456_v42  ;;  %v474_v60 = vadd.f32 %v442_v20, %v376_v53  ;;  %v619_v30 = vmul.f32 %v1170_v50, %v1590_v7 }
  0x34   :  { %v566_v58 = vld [vmem:[#allocation2 + $0x80] sm:$0xff]  ;;  %v567_v59 = vld [vmem:[#allocation2 + $0x88] sm:$0xff]  ;;  %v1136_v63 = vld [vmem:[%s2293_s2 + $0x238] sm:$0xff]  ;;  %v282_v0 = vadd.f32 %v250_v23, %v184_v56  ;;  %v283_v1 = vadd.f32 %v251_v31, %v185_v57  ;;  %505 = vst.msk [vmem:[#allocation2 + $0xa0] sm:$0xff] %vm103_vm0, %v473_v54  ;;  %v636_v31 = vmul.f32 %v1187_v55, %v1590_v7 }
  0x35   :  { %v1188_v61 = vld [vmem:[%s2293_s2 + $0x3a8] sm:$0xff]  ;;  %v664_v3 = vadd.f32 %v1627_v29, %v566_v58  ;;  %v665_v4 = vadd.f32 %v1684_v6, %v567_v59  ;;  %v359_v5 = vld [vmem:[#allocation2 + $0x20] sm:$0xff]  ;;  %506 = vst.msk [vmem:[#allocation2 + $0xa8] sm:$0xff] %vm103_vm0, %v474_v60  ;;  %v64_v18 = vld [vmem:[%s2293_s2 + $0xd0] sm:$0xff]  ;;  %v428_v24 = vmul.f32 %v1136_v63, %v1556_v51 }
  0x36   :  { %v360_v8 = vld [vmem:[#allocation2 + $0x28] sm:$0xff]  ;;  %v1153_v11 = vld [vmem:[%s2293_s2 + $0x2c0] sm:$0xff]  ;;  %v457_v14 = vadd.f32 %v425_v44, %v359_v5  ;;  %314 = vst.msk [vmem:[#allocation2 + $0xc0] sm:$0xff] %vm103_vm0, %v282_v0  ;;  %315 = vst.msk [vmem:[#allocation2 + $0xc8] sm:$0xff] %vm103_vm0, %v283_v1  ;;  %v97_v27 = vmul.f32 %v1448_v2, %v64_v18  ;;  %v637_v39 = vmul.f32 %v1188_v61, %v1590_v7 }
  0x37   :  { %v550_v29 = vld [vmem:[#allocation2] sm:$0xff]  ;;  %v551_v6 = vld [vmem:[#allocation2 + $0x8] sm:$0xff]  ;;  %v458_v15 = vadd.f32 %v426_v45, %v360_v8  ;;  %696 = vst.msk [vmem:[#allocation2 + $0x80] sm:$0xff] %vm103_vm0, %v664_v3  ;;  %697 = vst.msk [vmem:[#allocation2 + $0x88] sm:$0xff] %vm103_vm0, %v665_v4 }
  0x38   :  { %v648_v19 = vadd.f32 %v616_v34, %v550_v29  ;;  %v649_v20 = vadd.f32 %v617_v41, %v551_v6  ;;  %v1171_v21 = vld [vmem:[%s2293_s2 + $0x320] sm:$0xff]  ;;  %v1172_v22 = vld [vmem:[%s2293_s2 + $0x328] sm:$0xff]  ;;  %v377_v23 = vld [vmem:[#allocation2 + $0xb0] sm:$0xff]  ;;  %489 = vst.msk [vmem:[#allocation2 + $0x20] sm:$0xff] %vm103_vm0, %v457_v14  ;;  %v445_v41 = vmul.f32 %v1153_v11, %v1556_v51 }
  0x39   :  { %v1154_v25 = vld [vmem:[%s2293_s2 + $0x2c8] sm:$0xff]  ;;  %v65_v26 = vld [vmem:[%s2293_s2 + $0xd8] sm:$0xff]  ;;  %v568_v28 = vld [vmem:[#allocation2 + $0x90] sm:$0xff]  ;;  %490 = vst.msk [vmem:[#allocation2 + $0x28] sm:$0xff] %vm103_vm0, %v458_v15  ;;  %v475_v33 = vadd.f32 %v443_v62, %v377_v23  ;;  %v620_v61 = vmul.f32 %v1171_v21, %v1590_v7 }
  0x3a   :  { %v378_v32 = vld [vmem:[#allocation2 + $0xb8] sm:$0xff]  ;;  %v1189_v34 = vld [vmem:[%s2293_s2 + $0x3b0] sm:$0xff]  ;;  %v98_v35 = vmul.f32 %v1448_v2, %v65_v26  ;;  %680 = vst.msk [vmem:[#allocation2] sm:$0xff] %vm103_vm0, %v648_v19  ;;  %681 = vst.msk [vmem:[#allocation2 + $0x8] sm:$0xff] %vm103_vm0, %v649_v20  ;;  %v666_v38 = vadd.f32 %v1741_v48, %v568_v28  ;;  %v446_v50 = vmul.f32 %v1154_v25, %v1556_v51 }
  0x3b   :  { %v1117_v36 = vld [vmem:[%s2293_s2 + $0x1d0] sm:$0xff]  ;;  %v569_v37 = vld [vmem:[#allocation2 + $0x98] sm:$0xff]  ;;  %v476_v40 = vadd.f32 %v444_v9, %v378_v32  ;;  %v168_v42 = vld [vmem:[#allocation2 + $0x40] sm:$0xff]  ;;  %130 = vst.msk [vmem:[#allocation2 + $0xd0] sm:$0xff] %vm103_vm0, %v97_v27  ;;  %v638_v5 = vmul.f32 %v1189_v34, %v1590_v7 }
  0x3c   :  { %v169_v43 = vld [vmem:[#allocation2 + $0x48] sm:$0xff]  ;;  %v667_v44 = vadd.f32 %v1744_v49, %v569_v37  ;;  %v552_v45 = vld [vmem:[#allocation2 + $0x10] sm:$0xff]  ;;  %507 = vst.msk [vmem:[#allocation2 + $0xb0] sm:$0xff] %vm103_vm0, %v475_v33  ;;  %v362_v47 = vld [vmem:[#allocation2 + $0x38] sm:$0xff]  ;;  %v266_v53 = vadd.f32 %v234_v16, %v168_v42 }
  0x3d   :  { %v361_v46 = vld [vmem:[#allocation2 + $0x30] sm:$0xff]  ;;  %v267_v48 = vadd.f32 %v235_v17, %v169_v43  ;;  %131 = vst.msk [vmem:[#allocation2 + $0xd8] sm:$0xff] %vm103_vm0, %v98_v35  ;;  %698 = vst.msk [vmem:[#allocation2 + $0x90] sm:$0xff] %vm103_vm0, %v666_v38  ;;  %v553_v54 = vld [vmem:[#allocation2 + $0x18] sm:$0xff]  ;;  %v650_v55 = vadd.f32 %v1751_v52, %v552_v45  ;;  %v460_v57 = vadd.f32 %v428_v24, %v362_v47 }
  0x3e   :  { %508 = vst.msk [vmem:[#allocation2 + $0xb8] sm:$0xff] %vm103_vm0, %v476_v40  ;;  %v1190_v49 = vld [vmem:[%s2293_s2 + $0x3b8] sm:$0xff]  ;;  %v459_v56 = vadd.f32 %v427_v10, %v361_v46  ;;  %699 = vst.msk [vmem:[#allocation2 + $0x98] sm:$0xff] %vm103_vm0, %v667_v44  ;;  %v651_v59 = vadd.f32 %v619_v30, %v553_v54  ;;  %v570_v60 = vld [vmem:[#allocation2 + $0xa0] sm:$0xff]  ;;  %v621_v52 = vmul.f32 %v1172_v22, %v1590_v7 }
  0x3f   :  { %v1118_v58 = vld [vmem:[%s2293_s2 + $0x1d8] sm:$0xff]  ;;  %v1173_v62 = vld [vmem:[%s2293_s2 + $0x330] sm:$0xff]  ;;  %298 = vst.msk [vmem:[#allocation2 + $0x40] sm:$0xff] %vm103_vm0, %v266_v53  ;;  %299 = vst.msk [vmem:[#allocation2 + $0x48] sm:$0xff] %vm103_vm0, %v267_v48  ;;  %v668_v4 = vadd.f32 %v636_v31, %v570_v60  ;;  %v252_v10 = vmul.f32 %v1117_v36, %v1474_v13  ;;  %v639_v22 = vmul.f32 %v1190_v49, %v1590_v7 }
  0x40   :  { %v1174_v63 = vld [vmem:[%s2293_s2 + $0x338] sm:$0xff]  ;;  %v1137_v0 = vld [vmem:[%s2293_s2 + $0x240] sm:$0xff]  ;;  %v1138_v1 = vld [vmem:[%s2293_s2 + $0x248] sm:$0xff]  ;;  %682 = vst.msk [vmem:[#allocation2 + $0x10] sm:$0xff] %vm103_vm0, %v650_v55  ;;  %v253_v17 = vmul.f32 %v1118_v58, %v1474_v13  ;;  %v622_v37 = vmul.f32 %v1173_v62, %v1590_v7 }
  0x41   :  { %v571_v3 = vld [vmem:[#allocation2 + $0xa8] sm:$0xff]  ;;  %491 = vst.msk [vmem:[#allocation2 + $0x30] sm:$0xff] %vm103_vm0, %v459_v56  ;;  %492 = vst.msk [vmem:[#allocation2 + $0x38] sm:$0xff] %vm103_vm0, %v460_v57  ;;  %v379_v8 = vld [vmem:[#allocation2 + $0xc0] sm:$0xff]  ;;  %v429_v24 = vmul.f32 %v1137_v0, %v1556_v51  ;;  %v430_v32 = vmul.f32 %v1138_v1, %v1556_v51  ;;  %v623_v38 = vmul.f32 %v1174_v63, %v1590_v7 }
  0x42   :  { %v380_v9 = vld [vmem:[#allocation2 + $0xc8] sm:$0xff]  ;;  %v762_v11 = vld [vmem:[#allocation2 + $0x80] sm:$0xff]  ;;  %683 = vst.msk [vmem:[#allocation2 + $0x18] sm:$0xff] %vm103_vm0, %v651_v59  ;;  %v669_v6 = vadd.f32 %v637_v39, %v571_v3  ;;  %v477_v14 = vadd.f32 %v445_v41, %v379_v8  ;;  %v48_v18 = vld [vmem:[%s2293_s2 + $0x50] sm:$0xff] }
  0x43   :  { %v763_v29 = vld [vmem:[#allocation2 + $0x88] sm:$0xff]  ;;  %v478_v15 = vadd.f32 %v446_v50, %v380_v9  ;;  %v1191_v16 = vld [vmem:[%s2293_s2 + $0x3c0] sm:$0xff]  ;;  %700 = vst.msk [vmem:[#allocation2 + $0xa0] sm:$0xff] %vm103_vm0, %v668_v4  ;;  %v49_v25 = vld [vmem:[%s2293_s2 + $0x58] sm:$0xff]  ;;  %v81_v26 = vmul.f32 %v1448_v2, %v48_v18 }
  0x44   :  { %v1294_v19 = vpack.c.bf16 %v763_v29, %v762_v11  ;;  %v554_v20 = vld [vmem:[#allocation2 + $0x20] sm:$0xff]  ;;  %v555_v21 = vld [vmem:[#allocation2 + $0x28] sm:$0xff]  ;;  %701 = vst.msk [vmem:[#allocation2 + $0xa8] sm:$0xff] %vm103_vm0, %v669_v6  ;;  %509 = vst.msk [vmem:[#allocation2 + $0xc0] sm:$0xff] %vm103_vm0, %v477_v14  ;;  %v82_v34 = vmul.f32 %v1448_v2, %v49_v25  ;;  %v640_v48 = vmul.f32 %v1191_v16, %v1590_v7 }
  0x45   :  { %v1192_v23 = vld [vmem:[%s2293_s2 + $0x3c8] sm:$0xff]  ;;  %v746_v27 = vld [vmem:[#allocation2] sm:$0xff]  ;;  %v652_v30 = vadd.f32 %v620_v61, %v554_v20  ;;  %v653_v31 = vadd.f32 %v621_v52, %v555_v21  ;;  %510 = vst.msk [vmem:[#allocation2 + $0xc8] sm:$0xff] %vm103_vm0, %v478_v15  ;;  %v186_v33 = vld [vmem:[#allocation2 + $0xd0] sm:$0xff] }
  0x46   :  { %v747_v28 = vld [vmem:[#allocation2 + $0x8] sm:$0xff]  ;;  %1296 = vmatprep.subr.msk.bf16.mxu0 %vm1776_vm1, %v1294_v19  ;;  %v572_v36 = vld [vmem:[#allocation2 + $0xb0] sm:$0xff]  ;;  %v187_v39 = vld [vmem:[#allocation2 + $0xd8] sm:$0xff]  ;;  %v284_v40 = vadd.f32 %v252_v10, %v186_v33  ;;  %114 = vst.msk [vmem:[#allocation2 + $0x50] sm:$0xff] %vm103_vm0, %v81_v26  ;;  %v641_v59 = vmul.f32 %v1192_v23, %v1590_v7 }
  0x47   :  { %v1297_v35 = vpack.c.bf16 %v747_v28, %v746_v27  ;;  %v1101_v41 = vld [vmem:[%s2293_s2 + $0x150] sm:$0xff]  ;;  %684 = vst.msk [vmem:[#allocation2 + $0x20] sm:$0xff] %vm103_vm0, %v652_v30  ;;  %685 = vst.msk [vmem:[#allocation2 + $0x28] sm:$0xff] %vm103_vm0, %v653_v31  ;;  %v573_v43 = vld [vmem:[#allocation2 + $0xb8] sm:$0xff]  ;;  %v670_v44 = vadd.f32 %v638_v5, %v572_v36  ;;  %v285_v45 = vadd.f32 %v253_v17, %v187_v39 }
  0x48   :  { %v764_v42 = vld [vmem:[#allocation2 + $0x90] sm:$0xff]  ;;  %115 = vst.msk [vmem:[#allocation2 + $0x58] sm:$0xff] %vm103_vm0, %v82_v34  ;;  %v1102_v47 = vld [vmem:[%s2293_s2 + $0x158] sm:$0xff]  ;;  %v671_v53 = vadd.f32 %v639_v22, %v573_v43  ;;  %v363_v54 = vld [vmem:[#allocation2 + $0x40] sm:$0xff]  ;;  %v236_v1 = vmul.f32 %v1101_v41, %v1474_v13 }
  0x49   :  { %v1155_v46 = vld [vmem:[%s2293_s2 + $0x2d0] sm:$0xff]  ;;  %1299 = vmatpush3.bf16.xpose.msk.msra.mxu0 %vm1776_vm1, %v1297_v35  ;;  %v765_v50 = vld [vmem:[#allocation2 + $0x98] sm:$0xff]  ;;  %v364_v55 = vld [vmem:[#allocation2 + $0x48] sm:$0xff]  ;;  %316 = vst.msk [vmem:[#allocation2 + $0xd0] sm:$0xff] %vm103_vm0, %v284_v40  ;;  %v461_v60 = vadd.f32 %v429_v24, %v363_v54  ;;  %v237_v8 = vmul.f32 %v1102_v47, %v1474_v13 }
  0x4a   :  { %v1300_v49 = vpack.c.bf16 %v765_v50, %v764_v42  ;;  %v748_v56 = vld [vmem:[#allocation2 + $0x10] sm:$0xff]  ;;  %702 = vst.msk [vmem:[#allocation2 + $0xb0] sm:$0xff] %vm103_vm0, %v670_v44  ;;  %v557_v58 = vld [vmem:[#allocation2 + $0x38] sm:$0xff]  ;;  %v462_v61 = vadd.f32 %v430_v32, %v364_v55  ;;  %317 = vst.msk [vmem:[#allocation2 + $0xd8] sm:$0xff] %vm103_vm0, %v285_v45  ;;  %v447_v6 = vmul.f32 %v1155_v46, %v1556_v51 }
  0x4b   :  { %v556_v57 = vld [vmem:[#allocation2 + $0x30] sm:$0xff]  ;;  %v749_v52 = vld [vmem:[#allocation2 + $0x18] sm:$0xff]  ;;  %703 = vst.msk [vmem:[#allocation2 + $0xb8] sm:$0xff] %vm103_vm0, %v671_v53  ;;  %v655_v63 = vadd.f32 %v623_v38, %v557_v58  ;;  %v766_v3 = vld [vmem:[#allocation2 + $0xa0] sm:$0xff] }
  0x4c   :  { %v654_v62 = vadd.f32 %v622_v37, %v556_v57  ;;  %v1156_v0 = vld [vmem:[%s2293_s2 + $0x2d8] sm:$0xff]  ;;  %1302 = vmatprep.subr.msk.bf16.mxu0 %vm1776_vm1, %v1300_v49  ;;  %493 = vst.msk [vmem:[#allocation2 + $0x40] sm:$0xff] %vm103_vm0, %v461_v60  ;;  %494 = vst.msk [vmem:[#allocation2 + $0x48] sm:$0xff] %vm103_vm0, %v462_v61  ;;  %v1175_v4 = vld [vmem:[%s2293_s2 + $0x340] sm:$0xff]  ;;  %v1303_v9 = vpack.c.bf16 %v749_v52, %v748_v56 }
  0x4d   :  { %v1176_v5 = vld [vmem:[%s2293_s2 + $0x348] sm:$0xff]  ;;  %687 = vst.msk [vmem:[#allocation2 + $0x38] sm:$0xff] %vm103_vm0, %v655_v63  ;;  %v574_v11 = vld [vmem:[#allocation2 + $0xc0] sm:$0xff]  ;;  %v448_v17 = vmul.f32 %v1156_v0, %v1556_v51  ;;  %v170_v18 = vld [vmem:[#allocation2 + $0x50] sm:$0xff]  ;;  %v624_v25 = vmul.f32 %v1175_v4, %v1590_v7 }
  0x4e   :  { %v767_v10 = vld [vmem:[#allocation2 + $0xa8] sm:$0xff]  ;;  %686 = vst.msk [vmem:[#allocation2 + $0x30] sm:$0xff] %vm103_vm0, %v654_v62  ;;  %v672_v15 = vadd.f32 %v640_v48, %v574_v11  ;;  %v66_v19 = vld [vmem:[%s2293_s2 + $0xe0] sm:$0xff]  ;;  %v268_v22 = vadd.f32 %v236_v1, %v170_v18  ;;  %v625_v26 = vmul.f32 %v1176_v5, %v1590_v7  ;;  %v1139_v30 = vld [vmem:[%s2293_s2 + $0x250] sm:$0xff] }
  0x4f   :  { %v575_v29 = vld [vmem:[#allocation2 + $0xc8] sm:$0xff]  ;;  %v1306_v14 = vpack.c.bf16 %v767_v10, %v766_v3  ;;  %v171_v21 = vld [vmem:[#allocation2 + $0x58] sm:$0xff]  ;;  %v99_v23 = vmul.f32 %v1448_v2, %v66_v19  ;;  %v750_v31 = vld [vmem:[#allocation2 + $0x20] sm:$0xff]  ;;  %v431_v46 = vmul.f32 %v1139_v30, %v1556_v51 }
  0x50   :  { %v673_v16 = vadd.f32 %v641_v59, %v575_v29  ;;  %v67_v20 = vld [vmem:[%s2293_s2 + $0xe8] sm:$0xff]  ;;  %704 = vst.msk [vmem:[#allocation2 + $0xc0] sm:$0xff] %vm103_vm0, %v672_v15  ;;  %v381_v27 = vld [vmem:[#allocation2 + $0xd0] sm:$0xff]  ;;  %v269_v28 = vadd.f32 %v237_v8, %v171_v21  ;;  %300 = vst.msk [vmem:[#allocation2 + $0x50] sm:$0xff] %vm103_vm0, %v268_v22 }
  0x51   :  { %v100_v24 = vmul.f32 %v1448_v2, %v67_v20  ;;  %1305 = vmatpush3.bf16.xpose.msk.msra.mxu0 %vm1776_vm1, %v1303_v9  ;;  %v751_v32 = vld [vmem:[#allocation2 + $0x28] sm:$0xff]  ;;  %v382_v33 = vld [vmem:[#allocation2 + $0xd8] sm:$0xff]  ;;  %v479_v34 = vadd.f32 %v447_v6, %v381_v27  ;;  %132 = vst.msk [vmem:[#allocation2 + $0xe0] sm:$0xff] %vm103_vm0, %v99_v23  ;;  %v768_v36 = vld [vmem:[#allocation2 + $0xb0] sm:$0xff] }
  0x52   :  { %705 = vst.msk [vmem:[#allocation2 + $0xc8] sm:$0xff] %vm103_vm0, %v673_v16  ;;  %v1140_v35 = vld [vmem:[%s2293_s2 + $0x258] sm:$0xff]  ;;  %1308 = vmatprep.subr.msk.bf16.mxu0 %vm1776_vm1, %v1306_v14  ;;  %v480_v37 = vadd.f32 %v448_v17, %v382_v33  ;;  %301 = vst.msk [vmem:[#allocation2 + $0x58] sm:$0xff] %vm103_vm0, %v269_v28  ;;  %v1119_v38 = vld [vmem:[%s2293_s2 + $0x1e0] sm:$0xff]  ;;  %v1309_v50 = vpack.c.bf16 %v751_v32, %v750_v31 }
  0x53   :  { %133 = vst.msk [vmem:[#allocation2 + $0xe8] sm:$0xff] %vm103_vm0, %v100_v24  ;;  %v1120_v39 = vld [vmem:[%s2293_s2 + $0x1e8] sm:$0xff]  ;;  %v769_v40 = vld [vmem:[#allocation2 + $0xb8] sm:$0xff]  ;;  %v558_v41 = vld [vmem:[#allocation2 + $0x40] sm:$0xff]  ;;  %v254_v48 = vmul.f32 %v1119_v38, %v1474_v13  ;;  %v432_v57 = vmul.f32 %v1140_v35, %v1556_v51 }
  0x54   :  { %v559_v42 = vld [vmem:[#allocation2 + $0x48] sm:$0xff]  ;;  %511 = vst.msk [vmem:[#allocation2 + $0xd0] sm:$0xff] %vm103_vm0, %v479_v34  ;;  %v656_v43 = vadd.f32 %v624_v25, %v558_v41  ;;  %512 = vst.msk [vmem:[#allocation2 + $0xd8] sm:$0xff] %vm103_vm0, %v480_v37  ;;  %v1193_v45 = vld [vmem:[%s2293_s2 + $0x3d0] sm:$0xff]  ;;  %v255_v54 = vmul.f32 %v1120_v39, %v1474_v13  ;;  %v1312_v56 = vpack.c.bf16 %v769_v40, %v768_v36  ;;  %v138_v34 = vlaneseq }
  0x55   :  { %v657_v44 = vadd.f32 %v625_v26, %v559_v42  ;;  %v50_v47 = vld [vmem:[%s2293_s2 + $0x60] sm:$0xff]  ;;  %v1194_v53 = vld [vmem:[%s2293_s2 + $0x3d8] sm:$0xff]  ;;  %v51_v55 = vld [vmem:[%s2293_s2 + $0x68] sm:$0xff]  ;;  %v642_v59 = vmul.f32 %v1193_v45, %v1590_v7 }
  0x56   :  { %v83_v49 = vmul.f32 %v1448_v2, %v50_v47  ;;  %688 = vst.msk [vmem:[#allocation2 + $0x40] sm:$0xff] %vm103_vm0, %v656_v43  ;;  %v84_v58 = vmul.f32 %v1448_v2, %v51_v55  ;;  %v1103_v60 = vld [vmem:[%s2293_s2 + $0x160] sm:$0xff]  ;;  %v1104_v61 = vld [vmem:[%s2293_s2 + $0x168] sm:$0xff]  ;;  %v643_v52 = vmul.f32 %v1194_v53, %v1590_v7  ;;  %v68_v8 = vld [vmem:[%s2293_s2 + $0xf0] sm:$0xff]  ;;  %vm2069_vm2 = vcmp.lt.s32.totalorder %v138_v34, 256 }
  0x57   :  { %689 = vst.msk [vmem:[#allocation2 + $0x48] sm:$0xff] %vm103_vm0, %v657_v44  ;;  %v365_v62 = vld [vmem:[#allocation2 + $0x50] sm:$0xff]  ;;  %v69_v9 = vld [vmem:[%s2293_s2 + $0xf8] sm:$0xff]  ;;  %v101_v15 = vmul.f32 %v1448_v2, %v68_v8  ;;  %v770_v17 = vld [vmem:[#allocation2 + $0xc0] sm:$0xff]  ;;  %v238_v22 = vmul.f32 %v1103_v60, %v1474_v13  ;;  %v239_v26 = vmul.f32 %v1104_v61, %v1474_v13 }
  0x58   :  { %116 = vst.msk [vmem:[#allocation2 + $0x60] sm:$0xff] %vm103_vm0, %v83_v49  ;;  %v188_v63 = vld [vmem:[#allocation2 + $0xe0] sm:$0xff]  ;;  %117 = vst.msk [vmem:[#allocation2 + $0x68] sm:$0xff] %vm103_vm0, %v84_v58  ;;  %v463_v3 = vadd.f32 %v431_v46, %v365_v62  ;;  %v752_v10 = vld [vmem:[#allocation2 + $0x30] sm:$0xff]  ;;  %v102_v16 = vmul.f32 %v1448_v2, %v69_v9 }
  0x59   :  { %1311 = vmatpush3.bf16.xpose.msk.msra.mxu0 %vm1776_vm1, %v1309_v50  ;;  %v366_v1 = vld [vmem:[#allocation2 + $0x58] sm:$0xff]  ;;  %v286_v4 = vadd.f32 %v254_v48, %v188_v63  ;;  %v1177_v14 = vld [vmem:[%s2293_s2 + $0x350] sm:$0xff]  ;;  %v771_v18 = vld [vmem:[#allocation2 + $0xc8] sm:$0xff]  ;;  %134 = vst.msk [vmem:[#allocation2 + $0xf0] sm:$0xff] %vm103_vm0, %v101_v15 }
  0x5a   :  { %v189_v0 = vld [vmem:[#allocation2 + $0xe8] sm:$0xff]  ;;  %1314 = vmatprep.subr.msk.bf16.mxu0 %vm1776_vm1, %v1312_v56  ;;  %v753_v11 = vld [vmem:[#allocation2 + $0x38] sm:$0xff]  ;;  %v464_v6 = vadd.f32 %v432_v57, %v366_v1  ;;  %495 = vst.msk [vmem:[#allocation2 + $0x50] sm:$0xff] %vm103_vm0, %v463_v3  ;;  %v1157_v24 = vld [vmem:[%s2293_s2 + $0x2e0] sm:$0xff]  ;;  %v1318_v35 = vpack.c.bf16 %v771_v18, %v770_v17  ;;  %v626_v38 = vmul.f32 %v1177_v14, %v1590_v7 }
  0x5b   :  { %v287_v5 = vadd.f32 %v255_v54, %v189_v0  ;;  %v576_v29 = vld [vmem:[#allocation2 + $0xd0] sm:$0xff]  ;;  %v577_v19 = vld [vmem:[#allocation2 + $0xd8] sm:$0xff]  ;;  %318 = vst.msk [vmem:[#allocation2 + $0xe0] sm:$0xff] %vm103_vm0, %v286_v4  ;;  %v1158_v25 = vld [vmem:[%s2293_s2 + $0x2e8] sm:$0xff]  ;;  %v1315_v28 = vpack.c.bf16 %v753_v11, %v752_v10  ;;  %v449_v39 = vmul.f32 %v1157_v24, %v1556_v51 }
  0x5c   :  { %v674_v20 = vadd.f32 %v642_v59, %v576_v29  ;;  %v1178_v21 = vld [vmem:[%s2293_s2 + $0x358] sm:$0xff]  ;;  %v675_v23 = vadd.f32 %v643_v52, %v577_v19  ;;  %496 = vst.msk [vmem:[#allocation2 + $0x58] sm:$0xff] %vm103_vm0, %v464_v6  ;;  %135 = vst.msk [vmem:[#allocation2 + $0xf8] sm:$0xff] %vm103_vm0, %v102_v16  ;;  %v52_v27 = vld [vmem:[%s2293_s2 + $0x70] sm:$0xff]  ;;  %v450_v40 = vmul.f32 %v1158_v25, %v1556_v51 }
  0x5d   :  { %319 = vst.msk [vmem:[#allocation2 + $0xe8] sm:$0xff] %vm103_vm0, %v287_v5  ;;  %v1121_v30 = vld [vmem:[%s2293_s2 + $0x1f0] sm:$0xff]  ;;  %v1122_v31 = vld [vmem:[%s2293_s2 + $0x1f8] sm:$0xff]  ;;  %v85_v33 = vmul.f32 %v1448_v2, %v52_v27  ;;  %v754_v43 = vld [vmem:[#allocation2 + $0x40] sm:$0xff]  ;;  %v627_v44 = vmul.f32 %v1178_v21, %v1590_v7 }
  0x5e   :  { %706 = vst.msk [vmem:[#allocation2 + $0xd0] sm:$0xff] %vm103_vm0, %v674_v20  ;;  %v53_v32 = vld [vmem:[%s2293_s2 + $0x78] sm:$0xff]  ;;  %707 = vst.msk [vmem:[#allocation2 + $0xd8] sm:$0xff] %vm103_vm0, %v675_v23  ;;  %v1141_v46 = vld [vmem:[%s2293_s2 + $0x260] sm:$0xff]  ;;  %v256_v47 = vmul.f32 %v1121_v30, %v1474_v13  ;;  %v257_v50 = vmul.f32 %v1122_v31, %v1474_v13 }
  0x5f   :  { %v172_v36 = vld [vmem:[#allocation2 + $0x60] sm:$0xff]  ;;  %v86_v37 = vmul.f32 %v1448_v2, %v53_v32  ;;  %v173_v41 = vld [vmem:[#allocation2 + $0x68] sm:$0xff]  ;;  %118 = vst.msk [vmem:[#allocation2 + $0x70] sm:$0xff] %vm103_vm0, %v85_v33  ;;  %v1105_v53 = vld [vmem:[%s2293_s2 + $0x170] sm:$0xff]  ;;  %v433_v14 = vmul.f32 %v1141_v46, %v1556_v51 }
  0x60   :  { %v270_v42 = vadd.f32 %v238_v22, %v172_v36  ;;  %v271_v45 = vadd.f32 %v239_v26, %v173_v41  ;;  %v2052_v48 = vld [vmem:[%s2292_s1] sm:$0xff]  ;;  %v755_v54 = vld [vmem:[#allocation2 + $0x48] sm:$0xff]  ;;  %v1106_v49 = vld [vmem:[%s2293_s2 + $0x178] sm:$0xff]  ;;  %v240_v4 = vmul.f32 %v1105_v53, %v1474_v13 }
  0x61   :  { %119 = vst.msk [vmem:[#allocation2 + $0x78] sm:$0xff] %vm103_vm0, %v86_v37  ;;  %1317 = vmatpush3.bf16.xpose.msk.msra.mxu0 %vm1776_vm1, %v1315_v28  ;;  %v1142_v55 = vld [vmem:[%s2293_s2 + $0x268] sm:$0xff]  ;;  %1273 = vmatprep.mubr.msk.f32.mxu0 %vm103_vm0, %v2052_v48  ;;  %v136_v56 = vld [vmem:[%s2294_s3] ss:$4 sm:$0x3]  ;;  %v560_v58 = vld [vmem:[#allocation2 + $0x50] sm:$0xff]  ;;  %v241_v11 = vmul.f32 %v1106_v49, %v1474_v13  ;;  %v1321_v29 = vpack.c.bf16 %v755_v54, %v754_v43 }
  0x62   :  { %302 = vst.msk [vmem:[#allocation2 + $0x60] sm:$0xff] %vm103_vm0, %v270_v42  ;;  %1320 = vmatprep.subr.msk.bf16.mxu0 %vm1776_vm1, %v1318_v35  ;;  %v383_v59 = vld [vmem:[#allocation2 + $0xe0] sm:$0xff]  ;;  %303 = vst.msk [vmem:[#allocation2 + $0x68] sm:$0xff] %vm103_vm0, %v271_v45  ;;  %v137_v61 = vmul.f32 %v136_v56, %v1448_v2  ;;  %v658_v62 = vadd.f32 %v626_v38, %v560_v58  ;;  %v190_v1 = vld [vmem:[#allocation2 + $0xf0] sm:$0xff]  ;;  %v434_v19 = vmul.f32 %v1142_v55, %v1556_v51 }
  0x63   :  { %v561_v52 = vld [vmem:[#allocation2 + $0x58] sm:$0xff]  ;;  %v481_v63 = vadd.f32 %v449_v39, %v383_v59  ;;  %v288_v9 = vadd.f32 %v256_v47, %v190_v1  ;;  %v1123_v15 = vld [vmem:[%s2294_s3 + $0x1] ss:$4 sm:$0x3]  ;;  %v1196_v18 = vld [vmem:[%s2293_s2 + $0x3e8] sm:$0xff] }
  0x64   :  { %v384_v60 = vld [vmem:[#allocation2 + $0xe8] sm:$0xff]  ;;  %v191_v3 = vld [vmem:[#allocation2 + $0xf8] sm:$0xff]  ;;  %v659_v8 = vadd.f32 %v627_v44, %v561_v52  ;;  %142 = vst.msk [vmem:[#allocation3] sm:$0x3] %vm2069_vm2, %v137_v61  ;;  %v1195_v17 = vld [vmem:[%s2293_s2 + $0x3e0] sm:$0xff]  ;;  %v325_v27 = vmul.f32 %v1123_v15, %v1474_v13  ;;  %v645_v30 = vmul.f32 %v1196_v18, %v1590_v7 }
  0x65   :  { %v482_v0 = vadd.f32 %v450_v40, %v384_v60  ;;  %v772_v5 = vld [vmem:[#allocation2 + $0xd0] sm:$0xff]  ;;  %v289_v10 = vadd.f32 %v257_v50, %v191_v3  ;;  %v773_v6 = vld [vmem:[#allocation2 + $0xd8] sm:$0xff]  ;;  %690 = vst.msk [vmem:[#allocation2 + $0x50] sm:$0xff] %vm103_vm0, %v658_v62  ;;  %513 = vst.msk [vmem:[#allocation2 + $0xe0] sm:$0xff] %vm103_vm0, %v481_v63  ;;  %v644_v28 = vmul.f32 %v1195_v17, %v1590_v7 }
  0x66   :  { %v1324_v16 = vpack.c.bf16 %v773_v6, %v772_v5  ;;  %691 = vst.msk [vmem:[#allocation2 + $0x58] sm:$0xff] %vm103_vm0, %v659_v8  ;;  %320 = vst.msk [vmem:[#allocation2 + $0xf0] sm:$0xff] %vm103_vm0, %v288_v9  ;;  %v174_v20 = vld [vmem:[#allocation2 + $0x70] sm:$0xff]  ;;  %v1160_v22 = vld [vmem:[%s2293_s2 + $0x2f8] sm:$0xff] }
  0x67   :  { %514 = vst.msk [vmem:[#allocation2 + $0xe8] sm:$0xff] %vm103_vm0, %v482_v0  ;;  %321 = vst.msk [vmem:[#allocation2 + $0xf8] sm:$0xff] %vm103_vm0, %v289_v10  ;;  %v1159_v21 = vld [vmem:[%s2293_s2 + $0x2f0] sm:$0xff]  ;;  %v272_v24 = vadd.f32 %v240_v4, %v174_v20  ;;  %v1179_v35 = vld [vmem:[%s2293_s2 + $0x360] sm:$0xff]  ;;  %v452_v37 = vmul.f32 %v1160_v22, %v1556_v51 }
  0x68   :  { %v175_v23 = vld [vmem:[#allocation2 + $0x78] sm:$0xff]  ;;  %v451_v36 = vmul.f32 %v1159_v21, %v1556_v51  ;;  %v1143_v38 = vld [vmem:[%s2293_s2 + $0x270] sm:$0xff]  ;;  %v1180_v39 = vld [vmem:[%s2293_s2 + $0x368] sm:$0xff]  ;;  %v628_v60 = vmul.f32 %v1179_v35, %v1590_v7 }
  0x69   :  { %v367_v25 = vld [vmem:[#allocation2 + $0x60] sm:$0xff]  ;;  %v273_v26 = vadd.f32 %v241_v11, %v175_v23  ;;  %1323 = vmatpush3.bf16.xpose.msk.msra.mxu0 %vm1776_vm1, %v1321_v29  ;;  %v368_v31 = vld [vmem:[#allocation2 + $0x68] sm:$0xff]  ;;  %304 = vst.msk [vmem:[#allocation2 + $0x70] sm:$0xff] %vm103_vm0, %v272_v24  ;;  %v1144_v40 = vld [vmem:[%s2293_s2 + $0x278] sm:$0xff]  ;;  %v435_v55 = vmul.f32 %v1143_v38, %v1556_v51  ;;  %v629_v52 = vmul.f32 %v1180_v39, %v1590_v7 }
  0x6a   :  { %v465_v32 = vadd.f32 %v433_v14, %v367_v25  ;;  %1326 = vmatprep.subr.msk.bf16.mxu0 %vm1776_vm1, %v1324_v16  ;;  %v466_v33 = vadd.f32 %v434_v19, %v368_v31  ;;  %v436_v59 = vmul.f32 %v1144_v40, %v1556_v51  ;;  %v1161_v61 = vld [vmem:[%s2294_s3 + $0x2] ss:$4 sm:$0x3]  ;;  %v1197_v63 = vld [vmem:[%s2293_s2 + $0x3f0] sm:$0xff]  ;;  %v1198_v0 = vld [vmem:[%s2293_s2 + $0x3f8] sm:$0xff] }
  0x6b   :  { %305 = vst.msk [vmem:[#allocation2 + $0x78] sm:$0xff] %vm103_vm0, %v273_v26  ;;  %v322_v41 = vld [vmem:[#allocation3] sm:$0x3]  ;;  %v520_v8 = vmul.f32 %v1161_v61, %v1556_v51  ;;  %v646_v29 = vmul.f32 %v1197_v63, %v1590_v7  ;;  %v647_v6 = vmul.f32 %v1198_v0, %v1590_v7  ;;  %v1181_v14 = vld [vmem:[%s2293_s2 + $0x370] sm:$0xff]  ;;  %v1182_v15 = vld [vmem:[%s2293_s2 + $0x378] sm:$0xff] }
  0x6c   :  { %497 = vst.msk [vmem:[#allocation2 + $0x60] sm:$0xff] %vm103_vm0, %v465_v32  ;;  %v756_v42 = vld [vmem:[#allocation2 + $0x50] sm:$0xff]  ;;  %v578_v43 = vld [vmem:[#allocation2 + $0xe0] sm:$0xff]  ;;  %498 = vst.msk [vmem:[#allocation2 + $0x68] sm:$0xff] %vm103_vm0, %v466_v33  ;;  %v326_v45 = vadd.f32 %v325_v27, %v322_v41  ;;  %v630_v23 = vmul.f32 %v1181_v14, %v1590_v7  ;;  %v631_v26 = vmul.f32 %v1182_v15, %v1590_v7 }
  0x6d   :  { %v757_v46 = vld [vmem:[#allocation2 + $0x58] sm:$0xff]  ;;  %v676_v47 = vadd.f32 %v644_v28, %v578_v43  ;;  %v385_v53 = vld [vmem:[#allocation2 + $0xf0] sm:$0xff]  ;;  %v1199_v27 = vld [vmem:[%s2294_s3 + $0x3] ss:$4 sm:$0x3] }
  0x6e   :  { %v579_v44 = vld [vmem:[#allocation2 + $0xe8] sm:$0xff]  ;;  %v386_v54 = vld [vmem:[#allocation2 + $0xf8] sm:$0xff]  ;;  %v1327_v49 = vpack.c.bf16 %v757_v46, %v756_v42  ;;  %v483_v56 = vadd.f32 %v451_v36, %v385_v53  ;;  %327 = vst.msk [vmem:[#allocation3] sm:$0x3] %vm2069_vm2, %v326_v45  ;;  %v715_v35 = vmul.f32 %v1199_v27, %v1590_v7  ;;  %v143_v57 = vld [vmem:[%s2295_s4] sm:$0xff] }
  0x6f   :  { %v677_v50 = vadd.f32 %v645_v30, %v579_v44  ;;  %v484_v58 = vadd.f32 %v452_v37, %v386_v54  ;;  %708 = vst.msk [vmem:[#allocation2 + $0xe0] sm:$0xff] %vm103_vm0, %v676_v47  ;;  %v745_v46 = vld [vmem:[%s2292_s1 + $0x8] sm:$0xff]  ;;  %v1124_v47 = vld [vmem:[%s2295_s4 + $0x20] sm:$0xff] }
  0x70   :  { %515 = vst.msk [vmem:[#allocation2 + $0xf0] sm:$0xff] %vm103_vm0, %v483_v56  ;;  %v369_v62 = vld [vmem:[#allocation2 + $0x70] sm:$0xff]  ;;  %v144_v12 = vld [vmem:[%s2295_s4 + $0x8] sm:$0xff]  ;;  %v337_v54 = vmul.f32 %v1124_v47, %v1474_v13 }
  0x71   :  { %709 = vst.msk [vmem:[#allocation2 + $0xe8] sm:$0xff] %vm103_vm0, %v677_v50  ;;  %516 = vst.msk [vmem:[#allocation2 + $0xf8] sm:$0xff] %vm103_vm0, %v484_v58  ;;  %1329 = vmatpush3.bf16.xpose.msk.msra.mxu0 %vm1776_vm1, %v1327_v49  ;;  %v467_v3 = vadd.f32 %v435_v55, %v369_v62  ;;  %v147_v50 = vmul.f32 %v143_v57, %v1448_v2  ;;  %v1125_v53 = vld [vmem:[%s2295_s4 + $0x28] sm:$0xff]  ;;  %v1162_v49 = vld [vmem:[%s2295_s4 + $0x40] sm:$0xff] }
  0x72   :  { %v370_v1 = vld [vmem:[#allocation2 + $0x78] sm:$0xff]  ;;  %v338_v55 = vmul.f32 %v1125_v53, %v1474_v13  ;;  %v1163_v56 = vld [vmem:[%s2295_s4 + $0x48] sm:$0xff] }
  0x73   :  { %v562_v4 = vld [vmem:[#allocation2 + $0x60] sm:$0xff]  ;;  %v468_v5 = vadd.f32 %v436_v59, %v370_v1  ;;  %v563_v9 = vld [vmem:[#allocation2 + $0x68] sm:$0xff]  ;;  %499 = vst.msk [vmem:[#allocation2 + $0x70] sm:$0xff] %vm103_vm0, %v467_v3  ;;  %v341_v58 = vadd.f32 %v337_v54, %v147_v50  ;;  %v532_v59 = vmul.f32 %v1162_v49, %v1556_v51 }
  0x74   :  { %v660_v10 = vadd.f32 %v628_v60, %v562_v4  ;;  %v661_v11 = vadd.f32 %v629_v52, %v563_v9  ;;  %v533_v60 = vmul.f32 %v1163_v56, %v1556_v51  ;;  %v1200_v52 = vld [vmem:[%s2295_s4 + $0x60] sm:$0xff]  ;;  %v1201_v62 = vld [vmem:[%s2295_s4 + $0x68] sm:$0xff]  ;;  %v146_v9 = vld [vmem:[%s2295_s4 + $0x18] sm:$0xff] }
  0x75   :  { %500 = vst.msk [vmem:[#allocation2 + $0x78] sm:$0xff] %vm103_vm0, %v468_v5  ;;  %v517_v16 = vld [vmem:[#allocation3] sm:$0x3]  ;;  %v536_v63 = vadd.f32 %v532_v59, %v341_v58  ;;  %v727_v0 = vmul.f32 %v1200_v52, %v1590_v7  ;;  %v728_v1 = vmul.f32 %v1201_v62, %v1590_v7 }
  0x76   :  { %692 = vst.msk [vmem:[#allocation2 + $0x60] sm:$0xff] %vm103_vm0, %v660_v10  ;;  %v774_v17 = vld [vmem:[#allocation2 + $0xe0] sm:$0xff]  ;;  %693 = vst.msk [vmem:[#allocation2 + $0x68] sm:$0xff] %vm103_vm0, %v661_v11  ;;  %v521_v19 = vadd.f32 %v520_v8, %v517_v16  ;;  %v145_v8 = vld [vmem:[%s2295_s4 + $0x10] sm:$0xff] }
  0x77   :  { %v580_v21 = vld [vmem:[#allocation2 + $0xf0] sm:$0xff]  ;;  %v731_v4 = vadd.f32 %v727_v0, %v536_v63  ;;  %v149_v11 = vmul.f32 %v145_v8, %v1448_v2 }
  0x78   :  { %v775_v18 = vld [vmem:[#allocation2 + $0xe8] sm:$0xff]  ;;  %v581_v22 = vld [vmem:[#allocation2 + $0xf8] sm:$0xff]  ;;  %v678_v24 = vadd.f32 %v646_v29, %v580_v21  ;;  %522 = vst.msk [vmem:[#allocation3] sm:$0x3] %vm2069_vm2, %v521_v19  ;;  %v1126_v10 = vld [vmem:[%s2295_s4 + $0x30] sm:$0xff]  ;;  %v150_v29 = vmul.f32 %v146_v9, %v1448_v2 }
  0x79   :  { %v1330_v20 = vpack.c.bf16 %v775_v18, %v774_v17  ;;  %v679_v25 = vadd.f32 %v647_v6, %v581_v22  ;;  %v1127_v6 = vld [vmem:[%s2295_s4 + $0x38] sm:$0xff]  ;;  %v339_v14 = vmul.f32 %v1126_v10, %v1474_v13  ;;  %v1164_v17 = vld [vmem:[%s2295_s4 + $0x50] sm:$0xff] }
  0x7a   :  { %710 = vst.msk [vmem:[#allocation2 + $0xf0] sm:$0xff] %vm103_vm0, %v678_v24  ;;  %v564_v28 = vld [vmem:[#allocation2 + $0x70] sm:$0xff]  ;;  %v340_v16 = vmul.f32 %v1127_v6, %v1474_v13  ;;  %v1165_v18 = vld [vmem:[%s2295_s4 + $0x58] sm:$0xff] }
  0x7b   :  { %1332 = vmatprep.subr.msk.bf16.mxu0 %vm1776_vm1, %v1330_v20  ;;  %711 = vst.msk [vmem:[#allocation2 + $0xf8] sm:$0xff] %vm103_vm0, %v679_v25  ;;  %v662_v31 = vadd.f32 %v630_v23, %v564_v28  ;;  %v343_v19 = vadd.f32 %v339_v14, %v149_v11  ;;  %v534_v20 = vmul.f32 %v1164_v17, %v1556_v51  ;;  %v1202_v23 = vld [vmem:[%s2295_s4 + $0x70] sm:$0xff]  ;;  %v1203_v24 = vld [vmem:[%s2295_s4 + $0x78] sm:$0xff] }
  0x7c   :  { %v565_v30 = vld [vmem:[#allocation2 + $0x78] sm:$0xff]  ;;  %v535_v21 = vmul.f32 %v1165_v18, %v1556_v51  ;;  %v344_v22 = vadd.f32 %v340_v16, %v150_v29  ;;  %v730_v27 = vmul.f32 %v1203_v24, %v1590_v7 }
  0x7d   :  { %v758_v32 = vld [vmem:[#allocation2 + $0x60] sm:$0xff]  ;;  %v663_v33 = vadd.f32 %v631_v26, %v565_v30  ;;  %v759_v36 = vld [vmem:[#allocation2 + $0x68] sm:$0xff]  ;;  %694 = vst.msk [vmem:[#allocation2 + $0x70] sm:$0xff] %vm103_vm0, %v662_v31  ;;  %v538_v25 = vadd.f32 %v534_v20, %v343_v19  ;;  %v729_v26 = vmul.f32 %v1202_v23, %v1590_v7 }
  0x7e   :  { %v1333_v37 = vpack.c.bf16 %v759_v36, %v758_v32  ;;  %v539_v28 = vadd.f32 %v535_v21, %v344_v22  ;;  %v350_v36 = vld [vmem:[%s2296_s5 + $0x1] sm:$0x1] }
  0x7f   :  { %695 = vst.msk [vmem:[#allocation2 + $0x78] sm:$0xff] %vm103_vm0, %v663_v33  ;;  %v712_v38 = vld [vmem:[#allocation3] sm:$0x3]  ;;  %v733_v30 = vadd.f32 %v729_v26, %v538_v25 }
  0x80   :  { %1335 = vmatpush3.bf16.xpose.msk.msra.mxu0 %vm1776_vm1, %v1333_v37  ;;  %v716_v39 = vadd.f32 %v715_v35, %v712_v38  ;;  %v734_v31 = vadd.f32 %v730_v27, %v539_v28  ;;  %v155_v33 = vld [vmem:[%s2296_s5] sm:$0x1]  ;;  %v351_v37 = vmul.f32 %v350_v36, %v1474_v13 }
  0x81   :  { %v776_v40 = vld [vmem:[#allocation2 + $0xf0] sm:$0xff]  ;;  %v156_v35 = vmul.f32 %v155_v33, %v1448_v2 }
  0x82   :  { %v777_v41 = vld [vmem:[#allocation2 + $0xf8] sm:$0xff]  ;;  %717 = vst.msk [vmem:[#allocation3] sm:$0x3] %vm2069_vm2, %v716_v39  ;;  %v1346_v32 = vpack.c.bf16 %v734_v31, %v733_v30 }
  0x83   :  { %v1336_v42 = vpack.c.bf16 %v777_v41, %v776_v40  ;;  %158 = vst.msk [vmem:[#allocation5] sm:$0x1] %vm157_vm3, %v156_v35  ;;  %v545_v40 = vld [vmem:[%s2296_s5 + $0x2] sm:$0x1] }
  0x84   :  { %v760_v43 = vld [vmem:[#allocation2 + $0x70] sm:$0xff]  ;;  %v546_v41 = vmul.f32 %v545_v40, %v1556_v51 }
  0x85   :  { %1338 = vmatprep.subr.msk.bf16.mxu0 %vm1776_vm1, %v1336_v42 }
  0x86   :  { %v761_v44 = vld [vmem:[#allocation2 + $0x78] sm:$0xff] }
  0x87   :  { %v1339_v45 = vpack.c.bf16 %v761_v44, %v760_v43  ;;  %v740_v43 = vld [vmem:[%s2296_s5 + $0x3] sm:$0x1]  ;;  %s1401_s5 = smov [#allocation9]  }
  0x88   :  { %v741_v13 = vmul.f32 %v740_v43, %v1590_v7  ;;  %s1078_s8 = sshll.u32 %s1401_s5, 4  ;;  %s1079_s8 = int_to_ptr.vmem [resolvable:$true] %s1078_s8 }
  0x89   :  { %1341 = vmatpush3.bf16.xpose.msk.msra.mxu0 %vm1776_vm1, %v1339_v45  ;;  %s1374_s9 = scalar_lea.vmem %s1079_s8, 256  ;;  %p1379_p6 = scmp.lt.s32.totalorder %s1079_s8, %s1079_s8 }
  0x8a   :  { %v349_v38 = vld [vmem:[#allocation5] sm:$0x1]  ;;  %p1375_p5 = scmp.ne.s32.totalorder %s1079_s8, %s1374_s9  ;;  %p1380_p7 = scmp.lt.s32.totalorder %s1374_s9, %s1374_s9 }
  0x8b   :  { %v352_v39 = vadd.f32 %v351_v37, %v349_v38 }
  0x8c   :  { %p1381_p8 = por %p1380_p7, %p1379_p6 }
  0x8d   :  { %353 = vst.msk [vmem:[#allocation5] sm:$0x1] %vm157_vm3, %v352_v39 }
  0x8e   :  { %p1382_p9 = pnand %p1381_p8, %p1375_p5 }
  0x90   :  { %1274 = vmatmul.mubr.msk.f32.vlgmr.msra.gmra.mrb[0].mxu0 %vm103_vm0, %v2052_v48  ;;  %v148_v48 = vmul.f32 %v144_v12, %v1448_v2  ;;  %v778_v12 = vld [vmem:[#allocation3] sm:$0x3] }
  0x91   :  { %1275 = vmatprep.mubr.msk.f32.mxu0 %vm103_vm0, %v745_v46 }
  0x92   :  { %v342_v61 = vadd.f32 %v338_v55, %v148_v48 }
  0x94   :  { %1276 = vmatmul.mubr.msk.f32.gmra.mrb[2].mxu0 %vm103_vm0, %v745_v46  ;;  %v537_v3 = vadd.f32 %v533_v60, %v342_v61  ;;  %v544_v42 = vld [vmem:[#allocation5] sm:$0x1]  ;;  %v781_v46 = vshrl.u32 %v138_v34, 7 }
  0x95   :  { %v547_v2 = vadd.f32 %v546_v41, %v544_v42 }
  0x96   :  { %v732_v5 = vadd.f32 %v728_v1, %v537_v3  ;;  %v782_v57 = vsub.s32 0, %v781_v46  ;;  %v786_v47 = vsub.s32 1, %v781_v46 }
  0x97   :  { %548 = vst.msk [vmem:[#allocation5] sm:$0x1] %vm157_vm3, %v547_v2 }
  0x98   :  { %v1342_v15 = vpack.c.bf16 %v732_v5, %v731_v4  ;;  %v783_v51 = vrot.slane %v778_v12, %v782_v57  ;;  %v787_v50 = vrot.slane %v778_v12, %v786_v47 }
  0x9a   :  { %1343 = vmatprep.subr.bf16.mxu1 %v1342_v15 }
  0x9b   :  { %1345 = vmatpush3.bf16.xpose.msra.mxu1 %v1342_v15 }
  0x9c   :  { %1347 = vmatprep.subr.bf16.mxu1 %v1346_v32 }
  0x9e   :  { %v739_v44 = vld [vmem:[#allocation5] sm:$0x1] }
  0x9f   :  { %v742_v45 = vadd.f32 %v741_v13, %v739_v44 }
  0xa1   :  { %743 = vst.msk [vmem:[#allocation5] sm:$0x1] %vm157_vm3, %v742_v45 }
  0xa3   :  { %1349 = vmatpush3.bf16.xpose.msra.mxu1 %v1346_v32 }
  0xa8   :  { %v1240_v8 = vld [vmem:[#allocation5] ss:$0 sm:$0xff] }
 0x163   :  { %v958_v48 = vpop.f32.mrb[0].mxu0 }
 0x164   :  { %v959_v53 = vadd.f32 %v958_v48, %v783_v51  ;;  %v960_v54 = vpop.f32.mrb[1].mxu0 }
 0x165   :  { %v961_v55 = vadd.f32 %v960_v54, %v787_v50 }
 0x167   :  { %v1238_v49 = vmul.f32 -1.442695, %v961_v55  ;;  %v964_v56 = vpop.f32.mrb[2].mxu0 }
 0x168   :  { %v965_v58 = vadd.f32 %v964_v56, %v783_v51  ;;  %v966_v59 = vpop.f32.mrb[3].mxu0 }
 0x169   :  { %1354 = vpow2.f32 %v1238_v49  ;;  %v967_v7 = vadd.f32 %v966_v59, %v787_v50 }
 0x16b   :  { %v1239_v60 = vmul.f32 -1.442695, %v967_v7 }
 0x16d   :  { %1356 = vpow2.f32 %v1239_v60 }
 0x173   :  { %v1355_v61 = vpop.eup %1354 }
 0x174   :  { %v975_v52 = vadd.f32 1.0, %v1355_v61 }
 0x176   :  { %1358 = vrcp.f32 %v975_v52 }
 0x177   :  { %v1357_v34 = vpop.eup %1356 }
 0x178   :  { %v976_v62 = vadd.f32 1.0, %v1357_v34 }
 0x17a   :  { %1360 = vrcp.f32 %v976_v62 }
 0x180   :  { %v1359_v63 = vpop.eup %1358 }
 0x181   :  { %v981_v0 = vmul.f32 %v1359_v63, %v961_v55 }
 0x183   :  { %v983_v1 = vmul.f32 %v981_v0, %v959_v53 }
 0x184   :  { %v1361_v3 = vpop.eup %1360 }
 0x185   :  { %v982_v4 = vmul.f32 %v1361_v3, %v967_v7  ;;  %1291 = vmatprep.mubr.f32.mxu1 %v983_v1 }
 0x187   :  { %v984_v5 = vmul.f32 %v982_v4, %v965_v58 }
 0x189   :  { %1292 = vmatmul.mubr.f32.vlgmr.msra.gmra.mrb[0].mxu1 %v984_v5 }
 0x25c   :  { %v1293_v9 = vpop.f32.mrb[0].mxu1 }
 0x25d   :  { %v1068_v10 = vadd.f32 %v1293_v9, %v1240_v8  ;;  %v1062_v11 = vpop.f32.mrb[1].mxu1 }
 0x25e   :  { %v1063_v29 = vadd.f32 %v1240_v8, %v1062_v11 }
 0x25f   :  { %1072 = vst.msk [vmem:[#allocation9 + $0x8] sm:$0xff] %vm103_vm0, %v1068_v10 }
 0x260   :  { %1071 = vst.msk [vmem:[#allocation9] sm:$0xff] %vm103_vm0, %v1063_v29 }
 0x261   :  { %1385 = shalt.err (!%p1382_p9)
}
 0x262   :  { %s1386_s12 = scalar_lea.hbm %s2297_s6, 256 }
 0x263   :  { %p1387_p10 = scmp.ne.s32.totalorder %s2297_s6, %s1386_s12  ;;  %p1390_p11 = scmp.lt.u32.totalorder %s1386_s12, %s2297_s6 }
 0x265   :  { %p1392_p12 = pnand %p1390_p11, %p1387_p10 }
 0x267   :  { %1395 = shalt.err (!%p1392_p12)
}
 0x268   :  { %s1402_s16 = smov 128   ;;  %s1403_s17 = smov 8  }
 0x269   :  { %1084 = dma.vmem_to_hbm [thread:$0]  %s1079_s8, 256, %s2297_s6, [#allocation7], %s1402_s16, %s1402_s16, %s1403_s17  }
 0x26a   :  { %1398 = dma.done.wait [#allocation7], 256  }
 0x26b   :  { %1399 = vsyncadd [#allocation7], 4294967040 }
 0x26c   :  { %1088 = vsyncpa [#allocation7], 1 }
 0x26d   :  { %1089 = vsyncpa [#allocation8], 1 }

</bundles_post_ra>
